<compile_context>
chip_gen: v7x
topology: tpu7x:2x2x1
jax: 0.10.0
libtpu: 0.0.40
codegen_flags: <defaults>
</compile_context>

<pallas_src>
import functools

import jax
import jax.numpy as jnp
from jax.experimental import pallas as pl
from jax.experimental.pallas import tpu as pltpu

LANE = 128      # TPU lane width
SUBLANE = 8     # f32 sublane count


def _round_up(n, m):
    return ((n + m - 1) // m) * m


def _rep_spec(shape):
    """Full-array block, replicated across the batch-block grid."""
    n = len(shape)
    return pl.BlockSpec(shape, lambda i, _n=n: (0,) * _n)


def metalstm_kernel(emb_ref,                                   # (S, Bb, E)  f32
                    e_wih_ref, e_whh_ref, e_b_ref,             # bf16, bf16, f32
                    ln_g_ref, ln_b_ref,                        # (1, Hp) f32
                    fc_w_ref, fc_b_ref,                        # bf16, f32
                    d_wih_ref, d_whh_ref, d_b_ref,             # bf16, bf16, f32
                    out_w_ref, out_b_ref,                      # bf16, f32
                    feat_ref, idx_ref,                         # outputs
                    proj_ref, seq_ref,                         # VMEM scratch (reused)
                    h_ref, c_ref, pooled_ref,                  # VMEM scratch
                    *, H):
    f32 = jnp.float32
    bf16 = jnp.bfloat16

    S, B_BLK, E = emb_ref.shape
    H_pad = e_whh_ref.shape[0]
    G = 4 * H_pad
    V_pad = out_w_ref.shape[1]

    # ---- Phase 1: hoisted encoder input projection (one big matmul) ----
    emb2 = emb_ref[...].reshape(S * B_BLK, E).astype(bf16)
    xp = jnp.dot(emb2, e_wih_ref[...], preferred_element_type=f32)
    proj_ref[...] = (xp + e_b_ref[...]).reshape(S, B_BLK, G)

    # ---- broadcasts / weight loads hoisted out of the serial loops ----
    lane_id = jax.lax.broadcasted_iota(jnp.int32, (B_BLK, H_pad), 1)
    h_mask = (lane_id < H).astype(f32)
    ln_g = jnp.broadcast_to(ln_g_ref[...], (B_BLK, H_pad))
    ln_b = jnp.broadcast_to(ln_b_ref[...], (B_BLK, H_pad))
    e_whh = e_whh_ref[...]
    d_whh = d_whh_ref[...]
    inv_H = 1.0 / H

    zeros = jnp.zeros((B_BLK, H_pad), f32)
    h_ref[...] = zeros
    c_ref[...] = zeros
    pooled_ref[...] = zeros

    def gates(z):
        # H_pad is a multiple of 128 -> all four slices are lane-aligned.
        i = jax.nn.sigmoid(z[:, 0 * H_pad:1 * H_pad])
        f = jax.nn.sigmoid(z[:, 1 * H_pad:2 * H_pad])
        g = jnp.tanh(z[:, 2 * H_pad:3 * H_pad])
        o = jax.nn.sigmoid(z[:, 3 * H_pad:4 * H_pad])
        return i, f, g, o

    # ---- Phase 2: encoder recurrence (only h @ W_hh on the serial path) ----
    def enc_step(t, carry):
        h = h_ref[...]
        c = c_ref[...]
        z = proj_ref[t] + jnp.dot(h.astype(bf16), e_whh,
                                  preferred_element_type=f32)
        i, f, g, o = gates(z)
        c = f * c + i * g
        h = o * jnp.tanh(c)

        # LayerNorm over the real hidden dim (padded lanes are exactly zero)
        mu = jnp.sum(h, axis=-1, keepdims=True) * inv_H
        diff = (h - mu) * h_mask
        var = jnp.sum(diff * diff, axis=-1, keepdims=True) * inv_H
        ln = diff * jax.lax.rsqrt(var + 1e-5) * ln_g + ln_b

        pooled_ref[...] += ln
        seq_ref[t] = ln                 # saved for decoder input projection
        h_ref[...] = h
        c_ref[...] = c
        return carry

    jax.lax.fori_loop(0, S, enc_step, 0)

    # ---- Phase 3: mean pooling + fc head (one small matmul) ----
    pooled = pooled_ref[...] * (1.0 / S)
    feat_ref[...] = (jnp.dot(pooled.astype(bf16), fc_w_ref[...],
                             preferred_element_type=f32)
                     + fc_b_ref[...])

    # ---- Phase 4: hoisted decoder input projection (one big matmul);
    #      encoder projection is no longer needed, so proj_ref is reused ----
    ln2 = seq_ref[...].reshape(S * B_BLK, H_pad).astype(bf16)
    dp = jnp.dot(ln2, d_wih_ref[...], preferred_element_type=f32)
    proj_ref[...] = (dp + d_b_ref[...]).reshape(S, B_BLK, G)

    # ---- Phase 5: decoder recurrence (only h @ W_hh on the serial path);
    #      hidden states overwrite seq_ref in place (LN values consumed) ----
    h_ref[...] = zeros
    c_ref[...] = zeros

    def dec_step(t, carry):
        h = h_ref[...]
        c = c_ref[...]
        z = proj_ref[t] + jnp.dot(h.astype(bf16), d_whh,
                                  preferred_element_type=f32)
        i, f, g, o = gates(z)
        c = f * c + i * g
        h = o * jnp.tanh(c)
        h_ref[...] = h
        c_ref[...] = c
        seq_ref[t] = h                  # saved for deferred vocab projection
        return carry

    jax.lax.fori_loop(0, S, dec_step, 0)

    # ---- Phase 6: deferred vocab projection + argmax (one big matmul) ----
    # TODO(synk): for large vocabularies, tile this matmul over V (extra grid
    # axis or manual double-buffered DMA of out_w) to stay inside v7x VMEM.
    hd2 = seq_ref[...].reshape(S * B_BLK, H_pad).astype(bf16)
    logits = (jnp.dot(hd2, out_w_ref[...], preferred_element_type=f32)
              + out_b_ref[...])
    logits = logits.reshape(S, B_BLK, V_pad)
    m = jnp.max(logits, axis=-1, keepdims=True)
    iota = jax.lax.broadcasted_iota(jnp.int32, logits.shape, 2)
    big = jnp.iinfo(jnp.int32).max
    idx_ref[...] = jnp.min(jnp.where(logits == m, iota, big), axis=-1)


def prepare_params(params):
    """Pad / lane-align / cast the PyTorch-layout parameters for the kernel.

    Gate columns (i,f,g,o) are placed at 128-aligned offsets (H -> H_pad),
    hidden rows zero-padded to H_pad, vocab to V_pad (padded logits get a
    -1e30 bias so they never win the argmax). Big matrices go to bf16.
    """
    E, H4 = params["enc_wih"].shape
    H = H4 // 4
    V = params["out_w"].shape[1]
    H_pad = _round_up(H, LANE)
    V_pad = _round_up(V, LANE)
    bf16 = jnp.bfloat16

    def pad_gates(w, rows_to=None):
        in_dim = w.shape[0]
        w4 = w.reshape(in_dim, 4, H)
        out = jnp.zeros((in_dim, 4, H_pad), w.dtype).at[:, :, :H].set(w4)
        out = out.reshape(in_dim, 4 * H_pad)
        if rows_to is not None and rows_to > in_dim:
            out = jnp.pad(out, ((0, rows_to - in_dim), (0, 0)))
        return out

    def pad2(w, shape):
        return jnp.pad(w, ((0, shape[0] - w.shape[0]),
                           (0, shape[1] - w.shape[1])))

    return {
        "emb_table": params["emb_table"],
        "e_wih": pad_gates(params["enc_wih"]).astype(bf16),
        "e_whh": pad_gates(params["enc_whh"], rows_to=H_pad).astype(bf16),
        "e_b":   pad_gates(params["enc_b"]),
        "ln_g":  pad2(params["ln_g"], (1, H_pad)),
        "ln_b":  pad2(params["ln_b"], (1, H_pad)),
        "fc_w":  pad2(params["fc_w"], (H_pad, H_pad)).astype(bf16),
        "fc_b":  pad2(params["fc_b"], (1, H_pad)),
        "d_wih": pad_gates(params["dec_wih"], rows_to=H_pad).astype(bf16),
        "d_whh": pad_gates(params["dec_whh"], rows_to=H_pad).astype(bf16),
        "d_b":   pad_gates(params["dec_b"]),
        "out_w": pad2(params["out_w"], (H_pad, V_pad)).astype(bf16),
        "out_b": jnp.pad(params["out_b"], ((0, 0), (0, V_pad - V)),
                         constant_values=-1e30),
    }


@functools.partial(jax.jit, static_argnames=("hidden_dim",))
def metalstm_forward(x, prep, hidden_dim):
    H = hidden_dim
    B, S = x.shape
    H_pad = prep["ln_g"].shape[1]
    G = 4 * H_pad
    E = prep["e_wih"].shape[0]

    # batch padded to a sublane multiple; grid over batch blocks
    B_BLK = min(_round_up(B, SUBLANE), 128)
    B_pad = _round_up(B, B_BLK)
    NB = B_pad // B_BLK

    # embedding lookup (plain JAX gather), time-major, batch-padded
    # TODO(synk): fuse the gather into the kernel via scalar-prefetched indices
    # + pl.Element row blocks if HBM traffic on `emb` ever matters.
    emb = jnp.take(prep["emb_table"], x.T.astype(jnp.int32), axis=0)  # (S,B,E)
    emb = jnp.pad(emb, ((0, 0), (0, B_pad - B), (0, 0)))

    kernel = functools.partial(metalstm_kernel, H=H)

    weight_args = [prep["e_wih"], prep["e_whh"], prep["e_b"],
                   prep["ln_g"], prep["ln_b"],
                   prep["fc_w"], prep["fc_b"],
                   prep["d_wih"], prep["d_whh"], prep["d_b"],
                   prep["out_w"], prep["out_b"]]

    feat, idx = pl.pallas_call(
        kernel,
        grid=(NB,),
        in_specs=[pl.BlockSpec((S, B_BLK, E), lambda i: (0, i, 0))]
                 + [_rep_spec(w.shape) for w in weight_args],
        out_specs=(pl.BlockSpec((B_BLK, H_pad), lambda i: (i, 0)),
                   pl.BlockSpec((S, B_BLK), lambda i: (0, i))),
        out_shape=(jax.ShapeDtypeStruct((B_pad, H_pad), jnp.float32),
                   jax.ShapeDtypeStruct((S, B_pad), jnp.int32)),
        scratch_shapes=[
            pltpu.VMEM((S, B_BLK, G), jnp.float32),      # proj (enc then dec)
            pltpu.VMEM((S, B_BLK, H_pad), jnp.float32),  # seq (ln then h_dec)
            pltpu.VMEM((B_BLK, H_pad), jnp.float32),     # h state
            pltpu.VMEM((B_BLK, H_pad), jnp.float32),     # c state
            pltpu.VMEM((B_BLK, H_pad), jnp.float32),     # pooled accumulator
        ],
        compiler_params=pltpu.CompilerParams(
            dimension_semantics=("parallel",),
            vmem_limit_bytes=32 * 1024 * 1024),
        # TODO(synk): for very long sequences keep `emb` in HBM
        # (memory_space=pl.ANY) and manually double-buffer sequence chunks.
    )(emb, *weight_args)

    return feat[:B, :H], jnp.transpose(idx[:, :B])


def init_params(key, vocab_size, embed_dim, hidden_dim):
    H = hidden_dim
    ks = jax.random.split(key, 12)

    def u(k, shape, fan):
        b = 1.0 / (fan ** 0.5)
        return jax.random.uniform(k, shape, jnp.float32, -b, b)

    params = {
        # nn.Embedding default init: N(0, 1)
        "emb_table": jax.random.normal(ks[0], (vocab_size, embed_dim),
                                       jnp.float32),
        # encoder LSTM, weights stored transposed (in, 4H); b = b_ih + b_hh
        "enc_wih": u(ks[1], (embed_dim, 4 * H), H),
        "enc_whh": u(ks[2], (H, 4 * H), H),
        "enc_b":   u(ks[3], (1, 4 * H), H) + u(ks[4], (1, 4 * H), H),
        # LayerNorm default init
        "ln_g": jnp.ones((1, H), jnp.float32),
        "ln_b": jnp.zeros((1, H), jnp.float32),
        # fc: Linear(H, H), stored transposed (in, out)
        "fc_w": u(ks[5], (H, H), H),
        "fc_b": u(ks[6], (1, H), H),
        # decoder LSTM (input dim H)
        "dec_wih": u(ks[7], (H, 4 * H), H),
        "dec_whh": u(ks[8], (H, 4 * H), H),
        "dec_b":   u(ks[9], (1, 4 * H), H) + u(ks[10], (1, 4 * H), H),
        # decoder_fc: Linear(H, vocab_size), stored transposed (H, V)
        "out_w": u(ks[11], (H, vocab_size), H),
        "out_b": jnp.zeros((1, vocab_size), jnp.float32),
    }
    return params


if __name__ == "__main__":
    vocab_size, embed_dim, hidden_dim = 64, 16, 32
    B, S = 2, 8

    key = jax.random.PRNGKey(0)
    pkey, xkey = jax.random.split(key)
    params = init_params(pkey, vocab_size, embed_dim, hidden_dim)
    prep = prepare_params(params)
    x = jax.random.randint(xkey, (B, S), 0, vocab_size, dtype=jnp.int32)

    feat, idx = metalstm_forward(x, prep, hidden_dim=hidden_dim)
    jax.block_until_ready((feat, idx))

    assert feat.shape == (B, hidden_dim) and feat.dtype == jnp.float32
    assert idx.shape == (B, S) and idx.dtype == jnp.int32
    assert bool(jnp.all((idx >= 0) & (idx < vocab_size)))
    print("KERNEL_OK")
</pallas_src>

<mosaic_0001>
module attributes {stable_mosaic.version = 11 : i64} {
  func.func @metalstm_kernel(%arg0: i32, %arg1: memref<8x8x16xf32, #tpu.memory_space<vmem>>, %arg2: memref<16x512xbf16, #tpu.memory_space<vmem>>, %arg3: memref<128x512xbf16, #tpu.memory_space<vmem>>, %arg4: memref<1x512xf32, #tpu.memory_space<vmem>>, %arg5: memref<1x128xf32, #tpu.memory_space<vmem>>, %arg6: memref<1x128xf32, #tpu.memory_space<vmem>>, %arg7: memref<128x128xbf16, #tpu.memory_space<vmem>>, %arg8: memref<1x128xf32, #tpu.memory_space<vmem>>, %arg9: memref<128x512xbf16, #tpu.memory_space<vmem>>, %arg10: memref<128x512xbf16, #tpu.memory_space<vmem>>, %arg11: memref<1x512xf32, #tpu.memory_space<vmem>>, %arg12: memref<128x128xbf16, #tpu.memory_space<vmem>>, %arg13: memref<1x128xf32, #tpu.memory_space<vmem>>, %arg14: memref<8x128xf32, #tpu.memory_space<vmem>>, %arg15: memref<8x8xi32, #tpu.memory_space<vmem>>, %arg16: memref<8x8x512xf32, #tpu.memory_space<vmem>>, %arg17: memref<8x8x128xf32, #tpu.memory_space<vmem>>, %arg18: memref<8x128xf32, #tpu.memory_space<vmem>>, %arg19: memref<8x128xf32, #tpu.memory_space<vmem>>, %arg20: memref<8x128xf32, #tpu.memory_space<vmem>>) attributes {dimension_semantics = [#tpu.dimension_semantics<parallel>], iteration_bounds = array<i64: 1>, scalar_prefetch = 0 : i64, scratch_operands = 5 : i64, tpu.core_type = #tpu.core_type<tc>, window_params = [{transform_indices = @transform_0, window_bounds = array<i64: 8, 8, 16>}, {pipeline_mode = #tpu.pipeline_mode<synchronous>, transform_indices = @transform_1, window_bounds = array<i64: 16, 512>}, {pipeline_mode = #tpu.pipeline_mode<synchronous>, transform_indices = @transform_2, window_bounds = array<i64: 128, 512>}, {pipeline_mode = #tpu.pipeline_mode<synchronous>, transform_indices = @transform_3, window_bounds = array<i64: 1, 512>}, {pipeline_mode = #tpu.pipeline_mode<synchronous>, transform_indices = @transform_4, window_bounds = array<i64: 1, 128>}, {pipeline_mode = #tpu.pipeline_mode<synchronous>, transform_indices = @transform_5, window_bounds = array<i64: 1, 128>}, {pipeline_mode = #tpu.pipeline_mode<synchronous>, transform_indices = @transform_6, window_bounds = array<i64: 128, 128>}, {pipeline_mode = #tpu.pipeline_mode<synchronous>, transform_indices = @transform_7, window_bounds = array<i64: 1, 128>}, {pipeline_mode = #tpu.pipeline_mode<synchronous>, transform_indices = @transform_8, window_bounds = array<i64: 128, 512>}, {pipeline_mode = #tpu.pipeline_mode<synchronous>, transform_indices = @transform_9, window_bounds = array<i64: 128, 512>}, {pipeline_mode = #tpu.pipeline_mode<synchronous>, transform_indices = @transform_10, window_bounds = array<i64: 1, 512>}, {pipeline_mode = #tpu.pipeline_mode<synchronous>, transform_indices = @transform_11, window_bounds = array<i64: 128, 128>}, {pipeline_mode = #tpu.pipeline_mode<synchronous>, transform_indices = @transform_12, window_bounds = array<i64: 1, 128>}, {transform_indices = @transform_13, window_bounds = array<i64: 8, 128>}, {transform_indices = @transform_14, window_bounds = array<i64: 8, 8>}]} {
    %c0 = arith.constant 0 : index
    %c0_0 = arith.constant 0 : index
    %c0_1 = arith.constant 0 : index
    %0 = vector.load %arg1[%c0, %c0_0, %c0_1] : memref<8x8x16xf32, #tpu.memory_space<vmem>>, vector<8x8x16xf32>
    %1 = vector.shape_cast %0 : vector<8x8x16xf32> to vector<64x16xf32>
    %2 = arith.truncf %1 : vector<64x16xf32> to vector<64x16xbf16>
    %c0_2 = arith.constant 0 : index
    %c0_3 = arith.constant 0 : index
    %3 = vector.load %arg2[%c0_2, %c0_3] : memref<16x512xbf16, #tpu.memory_space<vmem>>, vector<16x512xbf16>
    %cst = arith.constant dense<0.000000e+00> : vector<64x512xf32>
    %4 = tpu.matmul %2, %3, %cst {dimension_numbers = #tpu.dot_dimension_numbers<[1], [0], [0], [1], [0, 0, 1, 1], [], []>} : vector<64x16xbf16>, vector<16x512xbf16>, vector<64x512xf32> -> vector<64x512xf32>
    %c0_4 = arith.constant 0 : index
    %c0_5 = arith.constant 0 : index
    %5 = vector.load %arg4[%c0_4, %c0_5] : memref<1x512xf32, #tpu.memory_space<vmem>>, vector<1x512xf32>
    %6 = vector.broadcast %5 : vector<1x512xf32> to vector<64x512xf32>
    %7 = arith.addf %4, %6 : vector<64x512xf32>
    %8 = vector.shape_cast %7 : vector<64x512xf32> to vector<8x8x512xf32>
    %c0_6 = arith.constant 0 : index
    %c0_7 = arith.constant 0 : index
    %c0_8 = arith.constant 0 : index
    %9 = vector.load %arg16[%c0_6, %c0_7, %c0_8] : memref<8x8x512xf32, #tpu.memory_space<vmem>>, vector<8x8x512xf32>
    tpu.vector_store %arg16[%c0_6, %c0_7, %c0_8], %8 {strides = array<i32>} : memref<8x8x512xf32, #tpu.memory_space<vmem>>, vector<8x8x512xf32>,
    %10 = tpu.iota {dimensions = array<i32: 1>} : vector<8x128xi32>
    %c32_i32 = arith.constant 32 : i32
    %11 = vector.broadcast %c32_i32 : i32 to vector<8x128xi32>
    %12 = arith.cmpi slt, %10, %11 : vector<8x128xi32>
    %13 = arith.extui %12 : vector<8x128xi1> to vector<8x128xi32>
    %14 = arith.sitofp %13 : vector<8x128xi32> to vector<8x128xf32>
    %c0_9 = arith.constant 0 : index
    %c0_10 = arith.constant 0 : index
    %15 = vector.load %arg5[%c0_9, %c0_10] : memref<1x128xf32, #tpu.memory_space<vmem>>, vector<1x128xf32>
    %16 = vector.shape_cast %15 : vector<1x128xf32> to vector<1x128xf32>
    %17 = vector.broadcast %16 : vector<1x128xf32> to vector<8x128xf32>
    %c0_11 = arith.constant 0 : index
    %c0_12 = arith.constant 0 : index
    %18 = vector.load %arg6[%c0_11, %c0_12] : memref<1x128xf32, #tpu.memory_space<vmem>>, vector<1x128xf32>
    %19 = vector.shape_cast %18 : vector<1x128xf32> to vector<1x128xf32>
    %20 = vector.broadcast %19 : vector<1x128xf32> to vector<8x128xf32>
    %c0_13 = arith.constant 0 : index
    %c0_14 = arith.constant 0 : index
    %21 = vector.load %arg3[%c0_13, %c0_14] : memref<128x512xbf16, #tpu.memory_space<vmem>>, vector<128x512xbf16>
    %c0_15 = arith.constant 0 : index
    %c0_16 = arith.constant 0 : index
    %22 = vector.load %arg10[%c0_15, %c0_16] : memref<128x512xbf16, #tpu.memory_space<vmem>>, vector<128x512xbf16>
    %cst_17 = arith.constant 0.000000e+00 : f32
    %23 = vector.broadcast %cst_17 : f32 to vector<8x128xf32>
    %c0_18 = arith.constant 0 : index
    %c0_19 = arith.constant 0 : index
    %24 = vector.load %arg18[%c0_18, %c0_19] : memref<8x128xf32, #tpu.memory_space<vmem>>, vector<8x128xf32>
    tpu.vector_store %arg18[%c0_18, %c0_19], %23 {strides = array<i32>} : memref<8x128xf32, #tpu.memory_space<vmem>>, vector<8x128xf32>,
    %c0_20 = arith.constant 0 : index
    %c0_21 = arith.constant 0 : index
    %25 = vector.load %arg19[%c0_20, %c0_21] : memref<8x128xf32, #tpu.memory_space<vmem>>, vector<8x128xf32>
    tpu.vector_store %arg19[%c0_20, %c0_21], %23 {strides = array<i32>} : memref<8x128xf32, #tpu.memory_space<vmem>>, vector<8x128xf32>,
    %c0_22 = arith.constant 0 : index
    %c0_23 = arith.constant 0 : index
    %26 = vector.load %arg20[%c0_22, %c0_23] : memref<8x128xf32, #tpu.memory_space<vmem>>, vector<8x128xf32>
    tpu.vector_store %arg20[%c0_22, %c0_23], %23 {strides = array<i32>} : memref<8x128xf32, #tpu.memory_space<vmem>>, vector<8x128xf32>,
    %c0_i32 = arith.constant 0 : i32
    %c8_i32 = arith.constant 8 : i32
    %27 = arith.addi %c0_i32, %c8_i32 : i32
    %c1_i32 = arith.constant 1 : i32
    scf.for %arg21 = %c0_i32 to %27 step %c1_i32  : i32 {
      %c0_66 = arith.constant 0 : index
      %c0_67 = arith.constant 0 : index
      %69 = vector.load %arg18[%c0_66, %c0_67] : memref<8x128xf32, #tpu.memory_space<vmem>>, vector<8x128xf32>
      %c0_68 = arith.constant 0 : index
      %c0_69 = arith.constant 0 : index
      %70 = vector.load %arg19[%c0_68, %c0_69] : memref<8x128xf32, #tpu.memory_space<vmem>>, vector<8x128xf32>
      %71 = arith.index_cast %arg21 : i32 to index
      %c0_70 = arith.constant 0 : index
      %c0_71 = arith.constant 0 : index
      %72 = vector.load %arg16[%71, %c0_70, %c0_71] : memref<8x8x512xf32, #tpu.memory_space<vmem>>, vector<1x8x512xf32>
      %73 = vector.shape_cast %72 : vector<1x8x512xf32> to vector<8x512xf32>
      %74 = arith.truncf %69 : vector<8x128xf32> to vector<8x128xbf16>
      %cst_72 = arith.constant dense<0.000000e+00> : vector<8x512xf32>
      %75 = tpu.matmul %74, %21, %cst_72 {dimension_numbers = #tpu.dot_dimension_numbers<[1], [0], [0], [1], [0, 0, 1, 1], [], []>} : vector<8x128xbf16>, vector<128x512xbf16>, vector<8x512xf32> -> vector<8x512xf32>
      %76 = arith.addf %73, %75 : vector<8x512xf32>
      %77 = vector.extract_strided_slice %76 {offsets = [0, 0], sizes = [8, 128], strides = [1, 1]} : vector<8x512xf32> to vector<8x128xf32>
      %78 = arith.negf %77 : vector<8x128xf32>
      %79 = math.exp %78 : vector<8x128xf32>
      %cst_73 = arith.constant 1.000000e+00 : f32
      %80 = vector.broadcast %cst_73 : f32 to vector<8x128xf32>
      %81 = arith.addf %80, %79 : vector<8x128xf32>
      %82 = arith.divf %80, %81 : vector<8x128xf32>
      %83 = vector.extract_strided_slice %76 {offsets = [0, 128], sizes = [8, 128], strides = [1, 1]} : vector<8x512xf32> to vector<8x128xf32>
      %84 = arith.negf %83 : vector<8x128xf32>
      %85 = math.exp %84 : vector<8x128xf32>
      %cst_74 = arith.constant 1.000000e+00 : f32
      %86 = vector.broadcast %cst_74 : f32 to vector<8x128xf32>
      %87 = arith.addf %86, %85 : vector<8x128xf32>
      %88 = arith.divf %86, %87 : vector<8x128xf32>
      %89 = vector.extract_strided_slice %76 {offsets = [0, 256], sizes = [8, 128], strides = [1, 1]} : vector<8x512xf32> to vector<8x128xf32>
      %90 = math.tanh %89 : vector<8x128xf32>
      %91 = vector.extract_strided_slice %76 {offsets = [0, 384], sizes = [8, 128], strides = [1, 1]} : vector<8x512xf32> to vector<8x128xf32>
      %92 = arith.negf %91 : vector<8x128xf32>
      %93 = math.exp %92 : vector<8x128xf32>
      %cst_75 = arith.constant 1.000000e+00 : f32
      %94 = vector.broadcast %cst_75 : f32 to vector<8x128xf32>
      %95 = arith.addf %94, %93 : vector<8x128xf32>
      %96 = arith.divf %94, %95 : vector<8x128xf32>
      %97 = arith.mulf %88, %70 : vector<8x128xf32>
      %98 = arith.mulf %82, %90 : vector<8x128xf32>
      %99 = arith.addf %97, %98 : vector<8x128xf32>
      %100 = math.tanh %99 : vector<8x128xf32>
      %101 = arith.mulf %96, %100 : vector<8x128xf32>
      %cst_76 = arith.constant dense<0.000000e+00> : vector<8xf32>
      %102 = vector.multi_reduction <add>, %101, %cst_76 [1] : vector<8x128xf32> to vector<8xf32>
      %103 = vector.shape_cast %102 : vector<8xf32> to vector<8x1xf32>
      %cst_77 = arith.constant 3.125000e-02 : f32
      %104 = vector.broadcast %cst_77 : f32 to vector<8x1xf32>
      %105 = arith.mulf %103, %104 : vector<8x1xf32>
      %106 = vector.broadcast %105 : vector<8x1xf32> to vector<8x128xf32>
      %107 = arith.subf %101, %106 : vector<8x128xf32>
      %108 = arith.mulf %107, %14 : vector<8x128xf32>
      %109 = arith.mulf %108, %108 : vector<8x128xf32>
      %cst_78 = arith.constant dense<0.000000e+00> : vector<8xf32>
      %110 = vector.multi_reduction <add>, %109, %cst_78 [1] : vector<8x128xf32> to vector<8xf32>
      %111 = vector.shape_cast %110 : vector<8xf32> to vector<8x1xf32>
      %cst_79 = arith.constant 3.125000e-02 : f32
      %112 = vector.broadcast %cst_79 : f32 to vector<8x1xf32>
      %113 = arith.mulf %111, %112 : vector<8x1xf32>
      %cst_80 = arith.constant 9.99999974E-6 : f32
      %114 = vector.broadcast %cst_80 : f32 to vector<8x1xf32>
      %115 = arith.addf %113, %114 : vector<8x1xf32>
      %116 = math.rsqrt %115 : vector<8x1xf32>
      %117 = vector.broadcast %116 : vector<8x1xf32> to vector<8x128xf32>
      %118 = arith.mulf %108, %117 : vector<8x128xf32>
      %119 = arith.mulf %118, %17 : vector<8x128xf32>
      %120 = arith.addf %119, %20 : vector<8x128xf32>
      %c0_81 = arith.constant 0 : index
      %c0_82 = arith.constant 0 : index
      %121 = vector.load %arg20[%c0_81, %c0_82] : memref<8x128xf32, #tpu.memory_space<vmem>>, vector<8x128xf32>
      %122 = arith.addf %121, %120 : vector<8x128xf32>
      %c0_83 = arith.constant 0 : index
      %c0_84 = arith.constant 0 : index
      %123 = vector.load %arg20[%c0_83, %c0_84] : memref<8x128xf32, #tpu.memory_space<vmem>>, vector<8x128xf32>
      tpu.vector_store %arg20[%c0_83, %c0_84], %122 {strides = array<i32>} : memref<8x128xf32, #tpu.memory_space<vmem>>, vector<8x128xf32>,
      %124 = arith.index_cast %arg21 : i32 to index
      %c0_85 = arith.constant 0 : index
      %c0_86 = arith.constant 0 : index
      %125 = vector.load %arg17[%124, %c0_85, %c0_86] : memref<8x8x128xf32, #tpu.memory_space<vmem>>, vector<1x8x128xf32>
      %126 = vector.shape_cast %125 : vector<1x8x128xf32> to vector<8x128xf32>
      %127 = vector.shape_cast %120 : vector<8x128xf32> to vector<1x8x128xf32>
      tpu.vector_store %arg17[%124, %c0_85, %c0_86], %127 {strides = array<i32>} : memref<8x8x128xf32, #tpu.memory_space<vmem>>, vector<1x8x128xf32>,
      %c0_87 = arith.constant 0 : index
      %c0_88 = arith.constant 0 : index
      %128 = vector.load %arg18[%c0_87, %c0_88] : memref<8x128xf32, #tpu.memory_space<vmem>>, vector<8x128xf32>
      tpu.vector_store %arg18[%c0_87, %c0_88], %101 {strides = array<i32>} : memref<8x128xf32, #tpu.memory_space<vmem>>, vector<8x128xf32>,
      %c0_89 = arith.constant 0 : index
      %c0_90 = arith.constant 0 : index
      %129 = vector.load %arg19[%c0_89, %c0_90] : memref<8x128xf32, #tpu.memory_space<vmem>>, vector<8x128xf32>
      tpu.vector_store %arg19[%c0_89, %c0_90], %99 {strides = array<i32>} : memref<8x128xf32, #tpu.memory_space<vmem>>, vector<8x128xf32>,
    }
    %c8_i32_24 = arith.constant 8 : i32
    %c0_25 = arith.constant 0 : index
    %c0_26 = arith.constant 0 : index
    %28 = vector.load %arg20[%c0_25, %c0_26] : memref<8x128xf32, #tpu.memory_space<vmem>>, vector<8x128xf32>
    %cst_27 = arith.constant 1.250000e-01 : f32
    %29 = vector.broadcast %cst_27 : f32 to vector<8x128xf32>
    %30 = arith.mulf %28, %29 : vector<8x128xf32>
    %31 = arith.truncf %30 : vector<8x128xf32> to vector<8x128xbf16>
    %c0_28 = arith.constant 0 : index
    %c0_29 = arith.constant 0 : index
    %32 = vector.load %arg7[%c0_28, %c0_29] : memref<128x128xbf16, #tpu.memory_space<vmem>>, vector<128x128xbf16>
    %cst_30 = arith.constant dense<0.000000e+00> : vector<8x128xf32>
    %33 = tpu.matmul %31, %32, %cst_30 {dimension_numbers = #tpu.dot_dimension_numbers<[1], [0], [0], [1], [0, 0, 1, 1], [], []>} : vector<8x128xbf16>, vector<128x128xbf16>, vector<8x128xf32> -> vector<8x128xf32>
    %c0_31 = arith.constant 0 : index
    %c0_32 = arith.constant 0 : index
    %34 = vector.load %arg8[%c0_31, %c0_32] : memref<1x128xf32, #tpu.memory_space<vmem>>, vector<1x128xf32>
    %35 = vector.broadcast %34 : vector<1x128xf32> to vector<8x128xf32>
    %36 = arith.addf %33, %35 : vector<8x128xf32>
    %c0_33 = arith.constant 0 : index
    %c0_34 = arith.constant 0 : index
    %37 = vector.load %arg14[%c0_33, %c0_34] : memref<8x128xf32, #tpu.memory_space<vmem>>, vector<8x128xf32>
    tpu.vector_store %arg14[%c0_33, %c0_34], %36 {strides = array<i32>} : memref<8x128xf32, #tpu.memory_space<vmem>>, vector<8x128xf32>,
    %c0_35 = arith.constant 0 : index
    %c0_36 = arith.constant 0 : index
    %c0_37 = arith.constant 0 : index
    %38 = vector.load %arg17[%c0_35, %c0_36, %c0_37] : memref<8x8x128xf32, #tpu.memory_space<vmem>>, vector<8x8x128xf32>
    %39 = vector.shape_cast %38 : vector<8x8x128xf32> to vector<64x128xf32>
    %40 = arith.truncf %39 : vector<64x128xf32> to vector<64x128xbf16>
    %c0_38 = arith.constant 0 : index
    %c0_39 = arith.constant 0 : index
    %41 = vector.load %arg9[%c0_38, %c0_39] : memref<128x512xbf16, #tpu.memory_space<vmem>>, vector<128x512xbf16>
    %cst_40 = arith.constant dense<0.000000e+00> : vector<64x512xf32>
    %42 = tpu.matmul %40, %41, %cst_40 {dimension_numbers = #tpu.dot_dimension_numbers<[1], [0], [0], [1], [0, 0, 1, 1], [], []>} : vector<64x128xbf16>, vector<128x512xbf16>, vector<64x512xf32> -> vector<64x512xf32>
    %c0_41 = arith.constant 0 : index
    %c0_42 = arith.constant 0 : index
    %43 = vector.load %arg11[%c0_41, %c0_42] : memref<1x512xf32, #tpu.memory_space<vmem>>, vector<1x512xf32>
    %44 = vector.broadcast %43 : vector<1x512xf32> to vector<64x512xf32>
    %45 = arith.addf %42, %44 : vector<64x512xf32>
    %46 = vector.shape_cast %45 : vector<64x512xf32> to vector<8x8x512xf32>
    %c0_43 = arith.constant 0 : index
    %c0_44 = arith.constant 0 : index
    %c0_45 = arith.constant 0 : index
    %47 = vector.load %arg16[%c0_43, %c0_44, %c0_45] : memref<8x8x512xf32, #tpu.memory_space<vmem>>, vector<8x8x512xf32>
    tpu.vector_store %arg16[%c0_43, %c0_44, %c0_45], %46 {strides = array<i32>} : memref<8x8x512xf32, #tpu.memory_space<vmem>>, vector<8x8x512xf32>,
    %c0_46 = arith.constant 0 : index
    %c0_47 = arith.constant 0 : index
    %48 = vector.load %arg18[%c0_46, %c0_47] : memref<8x128xf32, #tpu.memory_space<vmem>>, vector<8x128xf32>
    tpu.vector_store %arg18[%c0_46, %c0_47], %23 {strides = array<i32>} : memref<8x128xf32, #tpu.memory_space<vmem>>, vector<8x128xf32>,
    %c0_48 = arith.constant 0 : index
    %c0_49 = arith.constant 0 : index
    %49 = vector.load %arg19[%c0_48, %c0_49] : memref<8x128xf32, #tpu.memory_space<vmem>>, vector<8x128xf32>
    tpu.vector_store %arg19[%c0_48, %c0_49], %23 {strides = array<i32>} : memref<8x128xf32, #tpu.memory_space<vmem>>, vector<8x128xf32>,
    %c0_i32_50 = arith.constant 0 : i32
    %c8_i32_51 = arith.constant 8 : i32
    %50 = arith.addi %c0_i32_50, %c8_i32_51 : i32
    %c1_i32_52 = arith.constant 1 : i32
    scf.for %arg21 = %c0_i32_50 to %50 step %c1_i32_52  : i32 {
      %c0_66 = arith.constant 0 : index
      %c0_67 = arith.constant 0 : index
      %69 = vector.load %arg18[%c0_66, %c0_67] : memref<8x128xf32, #tpu.memory_space<vmem>>, vector<8x128xf32>
      %c0_68 = arith.constant 0 : index
      %c0_69 = arith.constant 0 : index
      %70 = vector.load %arg19[%c0_68, %c0_69] : memref<8x128xf32, #tpu.memory_space<vmem>>, vector<8x128xf32>
      %71 = arith.index_cast %arg21 : i32 to index
      %c0_70 = arith.constant 0 : index
      %c0_71 = arith.constant 0 : index
      %72 = vector.load %arg16[%71, %c0_70, %c0_71] : memref<8x8x512xf32, #tpu.memory_space<vmem>>, vector<1x8x512xf32>
      %73 = vector.shape_cast %72 : vector<1x8x512xf32> to vector<8x512xf32>
      %74 = arith.truncf %69 : vector<8x128xf32> to vector<8x128xbf16>
      %cst_72 = arith.constant dense<0.000000e+00> : vector<8x512xf32>
      %75 = tpu.matmul %74, %22, %cst_72 {dimension_numbers = #tpu.dot_dimension_numbers<[1], [0], [0], [1], [0, 0, 1, 1], [], []>} : vector<8x128xbf16>, vector<128x512xbf16>, vector<8x512xf32> -> vector<8x512xf32>
      %76 = arith.addf %73, %75 : vector<8x512xf32>
      %77 = vector.extract_strided_slice %76 {offsets = [0, 0], sizes = [8, 128], strides = [1, 1]} : vector<8x512xf32> to vector<8x128xf32>
      %78 = arith.negf %77 : vector<8x128xf32>
      %79 = math.exp %78 : vector<8x128xf32>
      %cst_73 = arith.constant 1.000000e+00 : f32
      %80 = vector.broadcast %cst_73 : f32 to vector<8x128xf32>
      %81 = arith.addf %80, %79 : vector<8x128xf32>
      %82 = arith.divf %80, %81 : vector<8x128xf32>
      %83 = vector.extract_strided_slice %76 {offsets = [0, 128], sizes = [8, 128], strides = [1, 1]} : vector<8x512xf32> to vector<8x128xf32>
      %84 = arith.negf %83 : vector<8x128xf32>
      %85 = math.exp %84 : vector<8x128xf32>
      %cst_74 = arith.constant 1.000000e+00 : f32
      %86 = vector.broadcast %cst_74 : f32 to vector<8x128xf32>
      %87 = arith.addf %86, %85 : vector<8x128xf32>
      %88 = arith.divf %86, %87 : vector<8x128xf32>
      %89 = vector.extract_strided_slice %76 {offsets = [0, 256], sizes = [8, 128], strides = [1, 1]} : vector<8x512xf32> to vector<8x128xf32>
      %90 = math.tanh %89 : vector<8x128xf32>
      %91 = vector.extract_strided_slice %76 {offsets = [0, 384], sizes = [8, 128], strides = [1, 1]} : vector<8x512xf32> to vector<8x128xf32>
      %92 = arith.negf %91 : vector<8x128xf32>
      %93 = math.exp %92 : vector<8x128xf32>
      %cst_75 = arith.constant 1.000000e+00 : f32
      %94 = vector.broadcast %cst_75 : f32 to vector<8x128xf32>
      %95 = arith.addf %94, %93 : vector<8x128xf32>
      %96 = arith.divf %94, %95 : vector<8x128xf32>
      %97 = arith.mulf %88, %70 : vector<8x128xf32>
      %98 = arith.mulf %82, %90 : vector<8x128xf32>
      %99 = arith.addf %97, %98 : vector<8x128xf32>
      %100 = math.tanh %99 : vector<8x128xf32>
      %101 = arith.mulf %96, %100 : vector<8x128xf32>
      %c0_76 = arith.constant 0 : index
      %c0_77 = arith.constant 0 : index
      %102 = vector.load %arg18[%c0_76, %c0_77] : memref<8x128xf32, #tpu.memory_space<vmem>>, vector<8x128xf32>
      tpu.vector_store %arg18[%c0_76, %c0_77], %101 {strides = array<i32>} : memref<8x128xf32, #tpu.memory_space<vmem>>, vector<8x128xf32>,
      %c0_78 = arith.constant 0 : index
      %c0_79 = arith.constant 0 : index
      %103 = vector.load %arg19[%c0_78, %c0_79] : memref<8x128xf32, #tpu.memory_space<vmem>>, vector<8x128xf32>
      tpu.vector_store %arg19[%c0_78, %c0_79], %99 {strides = array<i32>} : memref<8x128xf32, #tpu.memory_space<vmem>>, vector<8x128xf32>,
      %104 = arith.index_cast %arg21 : i32 to index
      %c0_80 = arith.constant 0 : index
      %c0_81 = arith.constant 0 : index
      %105 = vector.load %arg17[%104, %c0_80, %c0_81] : memref<8x8x128xf32, #tpu.memory_space<vmem>>, vector<1x8x128xf32>
      %106 = vector.shape_cast %105 : vector<1x8x128xf32> to vector<8x128xf32>
      %107 = vector.shape_cast %101 : vector<8x128xf32> to vector<1x8x128xf32>
      tpu.vector_store %arg17[%104, %c0_80, %c0_81], %107 {strides = array<i32>} : memref<8x8x128xf32, #tpu.memory_space<vmem>>, vector<1x8x128xf32>,
    }
    %c8_i32_53 = arith.constant 8 : i32
    %c0_54 = arith.constant 0 : index
    %c0_55 = arith.constant 0 : index
    %c0_56 = arith.constant 0 : index
    %51 = vector.load %arg17[%c0_54, %c0_55, %c0_56] : memref<8x8x128xf32, #tpu.memory_space<vmem>>, vector<8x8x128xf32>
    %52 = vector.shape_cast %51 : vector<8x8x128xf32> to vector<64x128xf32>
    %53 = arith.truncf %52 : vector<64x128xf32> to vector<64x128xbf16>
    %c0_57 = arith.constant 0 : index
    %c0_58 = arith.constant 0 : index
    %54 = vector.load %arg12[%c0_57, %c0_58] : memref<128x128xbf16, #tpu.memory_space<vmem>>, vector<128x128xbf16>
    %cst_59 = arith.constant dense<0.000000e+00> : vector<64x128xf32>
    %55 = tpu.matmul %53, %54, %cst_59 {dimension_numbers = #tpu.dot_dimension_numbers<[1], [0], [0], [1], [0, 0, 1, 1], [], []>} : vector<64x128xbf16>, vector<128x128xbf16>, vector<64x128xf32> -> vector<64x128xf32>
    %c0_60 = arith.constant 0 : index
    %c0_61 = arith.constant 0 : index
    %56 = vector.load %arg13[%c0_60, %c0_61] : memref<1x128xf32, #tpu.memory_space<vmem>>, vector<1x128xf32>
    %57 = vector.broadcast %56 : vector<1x128xf32> to vector<64x128xf32>
    %58 = arith.addf %55, %57 : vector<64x128xf32>
    %59 = vector.shape_cast %58 : vector<64x128xf32> to vector<8x8x128xf32>
    %cst_62 = arith.constant dense<0xFF800000> : vector<8x8xf32>
    %60 = vector.multi_reduction <maximumf>, %59, %cst_62 [2] : vector<8x8x128xf32> to vector<8x8xf32>
    %61 = vector.shape_cast %60 : vector<8x8xf32> to vector<8x8x1xf32>
    %62 = tpu.iota {dimensions = array<i32: 2>} : vector<8x8x128xi32>
    %63 = vector.broadcast %61 : vector<8x8x1xf32> to vector<8x8x128xf32>
    %64 = arith.cmpf oeq, %59, %63 : vector<8x8x128xf32>
    %c2147483647_i32 = arith.constant 2147483647 : i32
    %65 = vector.broadcast %c2147483647_i32 : i32 to vector<8x8x128xi32>
    %66 = arith.select %64, %62, %65 : vector<8x8x128xi1>, vector<8x8x128xi32>
    %cst_63 = arith.constant dense<2147483647> : vector<8x8xi32>
    %67 = vector.multi_reduction <minsi>, %66, %cst_63 [2] : vector<8x8x128xi32> to vector<8x8xi32>
    %c0_64 = arith.constant 0 : index
    %c0_65 = arith.constant 0 : index
    %68 = vector.load %arg15[%c0_64, %c0_65] : memref<8x8xi32, #tpu.memory_space<vmem>>, vector<8x8xi32>
    tpu.vector_store %arg15[%c0_64, %c0_65], %67 {strides = array<i32>} : memref<8x8xi32, #tpu.memory_space<vmem>>, vector<8x8xi32>,
    return
  }
  func.func @transform_0(%arg0: i32) -> (i32, i32, i32) {
    %c0_i32 = arith.constant 0 : i32
    %c0_i32_0 = arith.constant 0 : i32
    %c0_i32_1 = arith.constant 0 : i32
    return %c0_i32, %arg0, %c0_i32_0 : i32, i32, i32
  }
  func.func @transform_1(%arg0: i32) -> (i32, i32) {
    %c0_i32 = arith.constant 0 : i32
    %c0_i32_0 = arith.constant 0 : i32
    %c0_i32_1 = arith.constant 0 : i32
    return %c0_i32, %c0_i32_0 : i32, i32
  }
  func.func @transform_2(%arg0: i32) -> (i32, i32) {
    %c0_i32 = arith.constant 0 : i32
    %c0_i32_0 = arith.constant 0 : i32
    %c0_i32_1 = arith.constant 0 : i32
    return %c0_i32, %c0_i32_0 : i32, i32
  }
  func.func @transform_3(%arg0: i32) -> (i32, i32) {
    %c0_i32 = arith.constant 0 : i32
    %c0_i32_0 = arith.constant 0 : i32
    %c0_i32_1 = arith.constant 0 : i32
    return %c0_i32, %c0_i32_0 : i32, i32
  }
  func.func @transform_4(%arg0: i32) -> (i32, i32) {
    %c0_i32 = arith.constant 0 : i32
    %c0_i32_0 = arith.constant 0 : i32
    %c0_i32_1 = arith.constant 0 : i32
    return %c0_i32, %c0_i32_0 : i32, i32
  }
  func.func @transform_5(%arg0: i32) -> (i32, i32) {
    %c0_i32 = arith.constant 0 : i32
    %c0_i32_0 = arith.constant 0 : i32
    %c0_i32_1 = arith.constant 0 : i32
    return %c0_i32, %c0_i32_0 : i32, i32
  }
  func.func @transform_6(%arg0: i32) -> (i32, i32) {
    %c0_i32 = arith.constant 0 : i32
    %c0_i32_0 = arith.constant 0 : i32
    %c0_i32_1 = arith.constant 0 : i32
    return %c0_i32, %c0_i32_0 : i32, i32
  }
  func.func @transform_7(%arg0: i32) -> (i32, i32) {
    %c0_i32 = arith.constant 0 : i32
    %c0_i32_0 = arith.constant 0 : i32
    %c0_i32_1 = arith.constant 0 : i32
    return %c0_i32, %c0_i32_0 : i32, i32
  }
  func.func @transform_8(%arg0: i32) -> (i32, i32) {
    %c0_i32 = arith.constant 0 : i32
    %c0_i32_0 = arith.constant 0 : i32
    %c0_i32_1 = arith.constant 0 : i32
    return %c0_i32, %c0_i32_0 : i32, i32
  }
  func.func @transform_9(%arg0: i32) -> (i32, i32) {
    %c0_i32 = arith.constant 0 : i32
    %c0_i32_0 = arith.constant 0 : i32
    %c0_i32_1 = arith.constant 0 : i32
    return %c0_i32, %c0_i32_0 : i32, i32
  }
  func.func @transform_10(%arg0: i32) -> (i32, i32) {
    %c0_i32 = arith.constant 0 : i32
    %c0_i32_0 = arith.constant 0 : i32
    %c0_i32_1 = arith.constant 0 : i32
    return %c0_i32, %c0_i32_0 : i32, i32
  }
  func.func @transform_11(%arg0: i32) -> (i32, i32) {
    %c0_i32 = arith.constant 0 : i32
    %c0_i32_0 = arith.constant 0 : i32
    %c0_i32_1 = arith.constant 0 : i32
    return %c0_i32, %c0_i32_0 : i32, i32
  }
  func.func @transform_12(%arg0: i32) -> (i32, i32) {
    %c0_i32 = arith.constant 0 : i32
    %c0_i32_0 = arith.constant 0 : i32
    %c0_i32_1 = arith.constant 0 : i32
    return %c0_i32, %c0_i32_0 : i32, i32
  }
  func.func @transform_13(%arg0: i32) -> (i32, i32) {
    %c0_i32 = arith.constant 0 : i32
    %c0_i32_0 = arith.constant 0 : i32
    return %arg0, %c0_i32 : i32, i32
  }
  func.func @transform_14(%arg0: i32) -> (i32, i32) {
    %c0_i32 = arith.constant 0 : i32
    %c0_i32_0 = arith.constant 0 : i32
    return %c0_i32, %arg0 : i32, i32
  }
}

</mosaic_0001>

<bundles_post_ra>
// kernel: metalstm_forward.1
= control target key start
LH: loop header
LB: loop body
LE: loop exit
PB: predicated region body
PF: predicated region fallthrough
CT: control target
= control target key end

     0   :  { %20 = vsyncpa [#allocation8], 0  ;;  %s3335_s0 = inlined_call_operand.vmem [shape: f32[8,8,16], index: 0, kind: input, shape index: {}]   ;;  %s3336_s1 = inlined_call_operand.vmem [shape: bf16[16,512], index: 1, kind: input, shape index: {}]   ;;  %s3337_s2 = inlined_call_operand.vmem [shape: bf16[128,512], index: 2, kind: input, shape index: {}]   ;;  %s3338_s3 = inlined_call_operand.hbm [shape: f32[1,512], index: 3, kind: input, shape index: {}]   ;;  %s3339_s4 = inlined_call_operand.hbm [shape: f32[1,128], index: 4, kind: input, shape index: {}]   ;;  %s3340_s5 = inlined_call_operand.hbm [shape: f32[1,128], index: 5, kind: input, shape index: {}]   ;;  %s3341_s6 = inlined_call_operand.vmem [shape: bf16[128,128], index: 6, kind: input, shape index: {}]   ;;  %s3342_s7 = inlined_call_operand.hbm [shape: f32[1,128], index: 7, kind: input, shape index: {}]   ;;  %s3343_s8 = inlined_call_operand.hbm [shape: bf16[128,512], index: 8, kind: input, shape index: {}]   ;;  %s3344_s9 = inlined_call_operand.hbm [shape: bf16[128,512], index: 9, kind: input, shape index: {}]   ;;  %s3345_s10 = inlined_call_operand.hbm [shape: f32[1,512], index: 10, kind: input, shape index: {}]   ;;  %s3346_s11 = inlined_call_operand.vmem [shape: bf16[128,128], index: 11, kind: input, shape index: {}]   ;;  %s3347_s12 = inlined_call_operand.hbm [shape: f32[1,128], index: 12, kind: input, shape index: {}]   ;;  %s3348_s13 = inlined_call_operand.vmem [shape: f32[8,128], index: 13, kind: output, shape index: {0}]   ;;  %s3349_s14 = inlined_call_operand.vmem [shape: s32[8,8], index: 14, kind: output, shape index: {1}]  }
   0x1   :  { %21 = vsyncpa [#allocation10], 0 }
   0x2   :  { %22 = vsyncpa [#allocation13], 0 }
   0x3   :  { %23 = vsyncpa [#allocation16], 0 }
   0x4   :  { %24 = vsyncpa [#allocation19], 0  ;;  %s2547_s29 = smov [#allocation9]   ;;  %s2548_s15 = smov [#allocation12]  }
   0x5   :  { %s47_s30 = sshll.u32 %s2547_s29, 4  ;;  %s69_s16 = sshll.u32 %s2548_s15, 4  ;;  %s48_s30 = int_to_ptr.vmem [resolvable:$true] %s47_s30  ;;  %s70_s16 = int_to_ptr.vmem [resolvable:$true] %s69_s16 }
   0x6   :  { %s2345_s19 = scalar_lea.hbm %s3339_s4, 16 }
   0x7   :  { %p2346_p0 = scmp.ne.s32.totalorder %s3339_s4, %s2345_s19  ;;  %p2349_p1 = scmp.lt.u32.totalorder %s2345_s19, %s3339_s4 }
   0x9   :  { %p2351_p2 = pnand %p2349_p1, %p2346_p0 }
   0xb   :  { %2354 = shalt.err (!%p2351_p2)
}
   0xc   :  { %s2355_s24 = scalar_lea.vmem %s48_s30, 16  ;;  %s2359_s25 = scalar_lea.vmem %s48_s30, 32 }
   0xd   :  { %p2356_p3 = scmp.ne.s32.totalorder %s48_s30, %s2355_s24  ;;  %p2360_p4 = scmp.lt.s32.totalorder %s48_s30, %s48_s30 }
   0xe   :  { %p2361_p5 = scmp.lt.s32.totalorder %s2359_s25, %s2355_s24 }
  0x10   :  { %p2362_p6 = por %p2361_p5, %p2360_p4 }
  0x12   :  { %p2363_p7 = pnand %p2362_p6, %p2356_p3 }
  0x14   :  { %2366 = shalt.err (!%p2363_p7)
}
  0x15   :  { %50 = dma.hbm_to_vmem [thread:$0]  %s3339_s4, 16, %s48_s30, [#allocation10]  }
  0x16   :  { %s2367_s15 = scalar_lea.hbm %s3342_s7, 16 }
  0x17   :  { %p2368_p8 = scmp.ne.s32.totalorder %s3342_s7, %s2367_s15  ;;  %p2371_p9 = scmp.lt.u32.totalorder %s2367_s15, %s3342_s7 }
  0x19   :  { %p2373_p10 = pnand %p2371_p9, %p2368_p8 }
  0x1b   :  { %2376 = shalt.err (!%p2373_p10)
}
  0x1c   :  { %s2377_s21 = scalar_lea.vmem %s70_s16, 16  ;;  %s2381_s22 = scalar_lea.vmem %s70_s16, 32 }
  0x1d   :  { %p2378_p11 = scmp.ne.s32.totalorder %s70_s16, %s2377_s21  ;;  %p2382_p12 = scmp.lt.s32.totalorder %s70_s16, %s70_s16 }
  0x1e   :  { %p2383_p13 = scmp.lt.s32.totalorder %s2381_s22, %s2377_s21 }
  0x20   :  { %p2384_p0 = por %p2383_p13, %p2382_p12 }
  0x22   :  { %p2385_p1 = pnand %p2384_p0, %p2378_p11 }
  0x24   :  { %2388 = shalt.err (!%p2385_p1)
}
  0x25   :  { %72 = dma.hbm_to_vmem [thread:$0]  %s3342_s7, 16, %s70_s16, [#allocation13]  }
  0x26   :  { %s2549_s23 = smov [#allocation15]   ;;  %s2550_s25 = smov [#allocation7]  }
  0x27   :  { %s90_s24 = sshll.u32 %s2549_s23, 4  ;;  %s37_s26 = sshll.u32 %s2550_s25, 4  ;;  %s91_s24 = int_to_ptr.vmem [resolvable:$true] %s90_s24  ;;  %s38_s26 = int_to_ptr.vmem [resolvable:$true] %s37_s26 }
  0x28   :  { %s2389_s29 = scalar_lea.hbm %s3344_s9, 4096 }
  0x29   :  { %p2390_p2 = scmp.ne.s32.totalorder %s3344_s9, %s2389_s29  ;;  %p2393_p3 = scmp.lt.u32.totalorder %s2389_s29, %s3344_s9 }
  0x2b   :  { %p2395_p4 = pnand %p2393_p3, %p2390_p2 }
  0x2d   :  { %2398 = shalt.err (!%p2395_p4)
}
  0x2e   :  { %s2399_s7 = scalar_lea.vmem %s91_s24, 4096  ;;  %p2404_p6 = scmp.lt.s32.totalorder %s91_s24, %s91_s24 }
  0x2f   :  { %p2400_p5 = scmp.ne.s32.totalorder %s91_s24, %s2399_s7  ;;  %p2405_p7 = scmp.lt.s32.totalorder %s2399_s7, %s2399_s7 }
  0x31   :  { %p2406_p8 = por %p2405_p7, %p2404_p6 }
  0x33   :  { %p2407_p9 = pnand %p2406_p8, %p2400_p5 }
  0x35   :  { %2410 = shalt.err (!%p2407_p9)
}
  0x36   :  { %s2551_s16 = smov 256   ;;  %s2552_s20 = smov 16  }
  0x37   :  { %96 = dma.hbm_to_vmem [thread:$0]  %s3344_s9, 4096, %s91_s24, [#allocation16], %s2551_s16, %s2551_s16, %s2552_s20  }
  0x38   :  { %s2411_s23 = scalar_lea.hbm %s3338_s3, 64 }
  0x39   :  { %p2412_p10 = scmp.ne.s32.totalorder %s3338_s3, %s2411_s23  ;;  %p2415_p11 = scmp.lt.u32.totalorder %s2411_s23, %s3338_s3 }
  0x3b   :  { %p2417_p12 = pnand %p2415_p11, %p2412_p10 }
  0x3d   :  { %2420 = shalt.err (!%p2417_p12)
}
  0x3e   :  { %s2421_s15 = scalar_lea.vmem %s38_s26, 64  ;;  %p2426_p0 = scmp.lt.s32.totalorder %s38_s26, %s38_s26 }
  0x3f   :  { %p2422_p13 = scmp.ne.s32.totalorder %s38_s26, %s2421_s15  ;;  %p2427_p1 = scmp.lt.s32.totalorder %s2421_s15, %s2421_s15 }
  0x41   :  { %p2428_p2 = por %p2427_p1, %p2426_p0 }
  0x43   :  { %p2429_p3 = pnand %p2428_p2, %p2422_p13 }
  0x45   :  { %2432 = shalt.err (!%p2429_p3)
}
  0x46   :  { %40 = dma.hbm_to_vmem [thread:$0]  %s3338_s3, 64, %s38_s26, [#allocation8]  }
  0x47   :  { %s2553_s17 = smov [#allocation11]   ;;  %s2554_s19 = smov [#allocation14]  }
  0x48   :  { %s57_s18 = sshll.u32 %s2553_s17, 4  ;;  %s78_s7 = sshll.u32 %s2554_s19, 4  ;;  %s58_s18 = int_to_ptr.vmem [resolvable:$true] %s57_s18  ;;  %s2688_s7 = int_to_ptr.vmem [resolvable:$true] %s78_s7 }
  0x49   :  { %s2433_s4 = scalar_lea.hbm %s3340_s5, 16 }
  0x4a   :  { %p2434_p4 = scmp.ne.s32.totalorder %s3340_s5, %s2433_s4  ;;  %p2437_p5 = scmp.lt.u32.totalorder %s2433_s4, %s3340_s5 }
  0x4c   :  { %p2439_p6 = pnand %p2437_p5, %p2434_p4 }
  0x4e   :  { %2442 = shalt.err (!%p2439_p6)
}
  0x4f   :  { %s2443_s3 = scalar_lea.vmem %s58_s18, 16  ;;  %s2447_s26 = scalar_lea.vmem %s58_s18, 32 }
  0x50   :  { %p2444_p7 = scmp.ne.s32.totalorder %s58_s18, %s2443_s3  ;;  %p2448_p8 = scmp.lt.s32.totalorder %s58_s18, %s58_s18 }
  0x51   :  { %p2449_p9 = scmp.lt.s32.totalorder %s2447_s26, %s2443_s3 }
  0x53   :  { %p2450_p10 = por %p2449_p9, %p2448_p8 }
  0x55   :  { %p2451_p11 = pnand %p2450_p10, %p2444_p7 }
  0x57   :  { %2454 = shalt.err (!%p2451_p11)
}
  0x58   :  { %60 = dma.hbm_to_vmem [thread:$0]  %s3340_s5, 16, %s58_s18, [#allocation10]  }
  0x59   :  { %s2455_s24 = scalar_lea.hbm %s3343_s8, 4096 }
  0x5a   :  { %p2456_p12 = scmp.ne.s32.totalorder %s3343_s8, %s2455_s24  ;;  %p2459_p13 = scmp.lt.u32.totalorder %s2455_s24, %s3343_s8 }
  0x5c   :  { %p2461_p0 = pnand %p2459_p13, %p2456_p12 }
  0x5e   :  { %2464 = shalt.err (!%p2461_p0)
}
  0x5f   :  { %s2465_s4 = scalar_lea.vmem %s2688_s7, 4096  ;;  %p2470_p2 = scmp.lt.s32.totalorder %s2688_s7, %s2688_s7 }
  0x60   :  { %p2466_p1 = scmp.ne.s32.totalorder %s2688_s7, %s2465_s4  ;;  %p2471_p3 = scmp.lt.s32.totalorder %s2465_s4, %s2465_s4 }
  0x62   :  { %p2472_p4 = por %p2471_p3, %p2470_p2 }
  0x64   :  { %p2473_p5 = pnand %p2472_p4, %p2466_p1 }
  0x66   :  { %2476 = shalt.err (!%p2473_p5)
}
  0x67   :  { %84 = dma.hbm_to_vmem [thread:$0]  %s3343_s8, 4096, %s2688_s7, [#allocation13], %s2551_s16, %s2551_s16, %s2552_s20  }
  0x68   :  { %s2555_s30 = smov [#allocation17]   ;;  %s2556_s25 = smov [#allocation18]  }
  0x69   :  { %s103_s23 = sshll.u32 %s2555_s30, 4  ;;  %s115_s27 = sshll.u32 %s2556_s25, 4  ;;  %s104_s23 = int_to_ptr.vmem [resolvable:$true] %s103_s23  ;;  %s116_s27 = int_to_ptr.vmem [resolvable:$true] %s115_s27 }
  0x6a   :  { %s2477_s28 = scalar_lea.hbm %s3345_s10, 64 }
  0x6b   :  { %p2478_p6 = scmp.ne.s32.totalorder %s3345_s10, %s2477_s28  ;;  %p2481_p7 = scmp.lt.u32.totalorder %s2477_s28, %s3345_s10 }
  0x6d   :  { %p2483_p8 = pnand %p2481_p7, %p2478_p6 }
  0x6f   :  { %2486 = shalt.err (!%p2483_p8)
}
  0x70   :  { %s2487_s8 = scalar_lea.vmem %s104_s23, 64  ;;  %p2492_p10 = scmp.lt.s32.totalorder %s104_s23, %s104_s23 }
  0x71   :  { %p2488_p9 = scmp.ne.s32.totalorder %s104_s23, %s2487_s8  ;;  %p2493_p11 = scmp.lt.s32.totalorder %s2487_s8, %s2487_s8 }
  0x73   :  { %p2494_p12 = por %p2493_p11, %p2492_p10 }
  0x75   :  { %p2495_p13 = pnand %p2494_p12, %p2488_p9 }
  0x77   :  { %2498 = shalt.err (!%p2495_p13)
}
  0x78   :  { %106 = dma.hbm_to_vmem [thread:$0]  %s3345_s10, 64, %s104_s23, [#allocation16]  }
  0x79   :  { %s2499_s19 = scalar_lea.hbm %s3347_s12, 16 }
  0x7a   :  { %p2500_p0 = scmp.ne.s32.totalorder %s3347_s12, %s2499_s19  ;;  %p2503_p1 = scmp.lt.u32.totalorder %s2499_s19, %s3347_s12 }
  0x7c   :  { %p2505_p2 = pnand %p2503_p1, %p2500_p0 }
  0x7e   :  { %2508 = shalt.err (!%p2505_p2)
}
  0x7f   :  { %s2509_s18 = scalar_lea.vmem %s116_s27, 16  ;;  %s2513_s30 = scalar_lea.vmem %s116_s27, 32 }
  0x80   :  { %p2510_p3 = scmp.ne.s32.totalorder %s116_s27, %s2509_s18  ;;  %p2514_p4 = scmp.lt.s32.totalorder %s116_s27, %s116_s27 }
  0x81   :  { %p2515_p5 = scmp.lt.s32.totalorder %s2513_s30, %s2509_s18 }
  0x83   :  { %p2516_p6 = por %p2515_p5, %p2514_p4 }
  0x85   :  { %p2517_p7 = pnand %p2516_p6, %p2510_p3 }
  0x87   :  { %2520 = shalt.err (!%p2517_p7)
}
  0x88   :  { %118 = dma.hbm_to_vmem [thread:$0]  %s3347_s12, 16, %s116_s27, [#allocation19]  }
  0x89   :  { %2529 = dma.done.wait [#allocation8], 64  }
  0x8a   :  { %2530 = vsyncadd [#allocation8], 4294967232 }
  0x8b   :  { %2531 = dma.done.wait [#allocation10], 32  }
  0x8c   :  { %2532 = vsyncadd [#allocation10], 4294967264 }
  0x8d   :  { %2533 = dma.done.wait [#allocation13], 4112  }
  0x8e   :  { %2534 = vsyncadd [#allocation13], 4294963184 }
  0x8f   :  { %2535 = dma.done.wait [#allocation16], 4160  }
  0x90   :  { %2536 = vsyncadd [#allocation16], 4294963136 }
  0x91   :  { %2537 = dma.done.wait [#allocation19], 16  }
  0x92   :  { %2538 = vsyncadd [#allocation19], 4294967280  ;;  %v3350_v0 = vmov 0   ;;  %v2748_v1 = vld [vmem:[#allocation9] ss:$0 sm:$0xff]  ;;  %v2755_v3 = vld [vmem:[%s3337_s2] sm:$0xff] }
  0x93   :  { %247 = vmatprep.mubr.bf16.mxu0 %v3350_v0  ;;  %320 = vmatprep.mubr.bf16.mxu1 %v3350_v0  ;;  %v2750_v2 = vld [vmem:[#allocation11] ss:$0 sm:$0xff]  ;;  %3385 = vst [vmem:[#allocation25_spill] sm:$0xff] %v2755_v3  ;;  %v2760_v4 = vld [vmem:[%s3337_s2 + $0x8] sm:$0xff]  ;;  %v2765_v5 = vld [vmem:[%s3337_s2 + $0x10] sm:$0xff]  ;;  %vm202_vm0 = vcmask 130048  }
  0x94   :  { %v2770_v6 = vld [vmem:[%s3337_s2 + $0x18] sm:$0xff]  ;;  %v2775_v7 = vld [vmem:[%s3337_s2 + $0x20] sm:$0xff]  ;;  %v2780_v8 = vld [vmem:[%s3337_s2 + $0x28] sm:$0xff] }
  0x95   :  { %v2785_v9 = vld [vmem:[%s3337_s2 + $0x30] sm:$0xff]  ;;  %v2790_v10 = vld [vmem:[%s3337_s2 + $0x38] sm:$0xff]  ;;  %v2795_v11 = vld [vmem:[%s3337_s2 + $0x40] sm:$0xff] }
  0x96   :  { %v2800_v12 = vld [vmem:[%s3337_s2 + $0x48] sm:$0xff]  ;;  %v2805_v13 = vld [vmem:[%s3337_s2 + $0x50] sm:$0xff]  ;;  %v2810_v14 = vld [vmem:[%s3337_s2 + $0x58] sm:$0xff] }
  0x97   :  { %v2815_v15 = vld [vmem:[%s3337_s2 + $0x60] sm:$0xff]  ;;  %v2820_v16 = vld [vmem:[%s3337_s2 + $0x68] sm:$0xff]  ;;  %v2825_v17 = vld [vmem:[%s3337_s2 + $0x70] sm:$0xff] }
  0x98   :  { %v2830_v18 = vld [vmem:[%s3337_s2 + $0x78] sm:$0xff]  ;;  %v2835_v19 = vld [vmem:[%s3337_s2 + $0x80] sm:$0xff]  ;;  %v2840_v20 = vld [vmem:[%s3337_s2 + $0x88] sm:$0xff] }
  0x99   :  { %v2845_v21 = vld [vmem:[%s3337_s2 + $0x90] sm:$0xff]  ;;  %v2850_v22 = vld [vmem:[%s3337_s2 + $0x98] sm:$0xff]  ;;  %v2855_v23 = vld [vmem:[%s3337_s2 + $0xa0] sm:$0xff] }
  0x9a   :  { %v2860_v24 = vld [vmem:[%s3337_s2 + $0xa8] sm:$0xff]  ;;  %v2865_v25 = vld [vmem:[%s3337_s2 + $0xb0] sm:$0xff]  ;;  %v2870_v26 = vld [vmem:[%s3337_s2 + $0xb8] sm:$0xff] }
  0x9b   :  { %v2875_v27 = vld [vmem:[%s3337_s2 + $0xc0] sm:$0xff]  ;;  %v2880_v28 = vld [vmem:[%s3337_s2 + $0xc8] sm:$0xff]  ;;  %v2885_v29 = vld [vmem:[%s3337_s2 + $0xd0] sm:$0xff] }
  0x9c   :  { %v2890_v30 = vld [vmem:[%s3337_s2 + $0xd8] sm:$0xff]  ;;  %v2895_v31 = vld [vmem:[%s3337_s2 + $0xe0] sm:$0xff]  ;;  %v2900_v32 = vld [vmem:[%s3337_s2 + $0xe8] sm:$0xff] }
  0x9d   :  { %v2905_v33 = vld [vmem:[%s3337_s2 + $0xf0] sm:$0xff]  ;;  %v2910_v34 = vld [vmem:[%s3337_s2 + $0xf8] sm:$0xff]  ;;  %v2912_v35 = vld [vmem:[#allocation15] sm:$0xff] }
  0x9e   :  { %v2914_v36 = vld [vmem:[#allocation15 + $0x8] sm:$0xff]  ;;  %v2916_v37 = vld [vmem:[#allocation15 + $0x10] sm:$0xff]  ;;  %v2918_v38 = vld [vmem:[#allocation15 + $0x18] sm:$0xff] }
  0x9f   :  { %v2920_v39 = vld [vmem:[#allocation15 + $0x20] sm:$0xff]  ;;  %v2922_v40 = vld [vmem:[#allocation15 + $0x28] sm:$0xff]  ;;  %v2924_v41 = vld [vmem:[#allocation15 + $0x30] sm:$0xff] }
  0xa0   :  { %v2926_v42 = vld [vmem:[#allocation15 + $0x38] sm:$0xff]  ;;  %v2928_v43 = vld [vmem:[#allocation15 + $0x40] sm:$0xff]  ;;  %v2930_v44 = vld [vmem:[#allocation15 + $0x48] sm:$0xff] }
  0xa1   :  { %3386 = vst [vmem:[#allocation26_spill] sm:$0xff] %v2928_v43  ;;  %3387 = vst [vmem:[#allocation27_spill] sm:$0xff] %v2930_v44  ;;  %v2932_v45 = vld [vmem:[#allocation15 + $0x50] sm:$0xff]  ;;  %v2934_v46 = vld [vmem:[#allocation15 + $0x58] sm:$0xff] }
  0xa2   :  { %3388 = vst [vmem:[#allocation28_spill] sm:$0xff] %v2934_v46  ;;  %v2936_v47 = vld [vmem:[#allocation15 + $0x60] sm:$0xff]  ;;  %v2938_v48 = vld [vmem:[#allocation15 + $0x68] sm:$0xff]  ;;  %v2940_v49 = vld [vmem:[#allocation15 + $0x70] sm:$0xff] }
  0xa3   :  { %3389 = vst [vmem:[#allocation29_spill] sm:$0xff] %v2936_v47  ;;  %3390 = vst [vmem:[#allocation30_spill] sm:$0xff] %v2938_v48  ;;  %v2942_v50 = vld [vmem:[#allocation15 + $0x78] sm:$0xff]  ;;  %v2944_v51 = vld [vmem:[#allocation15 + $0x80] sm:$0xff] }
  0xa4   :  { %3391 = vst [vmem:[#allocation31_spill] sm:$0xff] %v2940_v49  ;;  %3392 = vst [vmem:[#allocation32_spill] sm:$0xff] %v2942_v50  ;;  %v2946_v52 = vld [vmem:[#allocation15 + $0x88] sm:$0xff]  ;;  %v2948_v53 = vld [vmem:[#allocation15 + $0x90] sm:$0xff] }
  0xa5   :  { %3393 = vst [vmem:[#allocation33_spill] sm:$0xff] %v2944_v51  ;;  %3394 = vst [vmem:[#allocation34_spill] sm:$0xff] %v2946_v52  ;;  %v2950_v54 = vld [vmem:[#allocation15 + $0x98] sm:$0xff]  ;;  %v2952_v55 = vld [vmem:[#allocation15 + $0xa0] sm:$0xff] }
  0xa6   :  { %3395 = vst [vmem:[#allocation35_spill] sm:$0xff] %v2948_v53  ;;  %3396 = vst [vmem:[#allocation36_spill] sm:$0xff] %v2950_v54  ;;  %v2954_v56 = vld [vmem:[#allocation15 + $0xa8] sm:$0xff]  ;;  %v2956_v57 = vld [vmem:[#allocation15 + $0xb0] sm:$0xff] }
  0xa7   :  { %3397 = vst [vmem:[#allocation37_spill] sm:$0xff] %v2952_v55  ;;  %3398 = vst [vmem:[#allocation38_spill] sm:$0xff] %v2954_v56  ;;  %v2958_v58 = vld [vmem:[#allocation15 + $0xb8] sm:$0xff]  ;;  %v2960_v59 = vld [vmem:[#allocation15 + $0xc0] sm:$0xff] }
  0xa8   :  { %3399 = vst [vmem:[#allocation39_spill] sm:$0xff] %v2956_v57  ;;  %3400 = vst [vmem:[#allocation40_spill] sm:$0xff] %v2958_v58  ;;  %v2962_v60 = vld [vmem:[#allocation15 + $0xc8] sm:$0xff]  ;;  %v2964_v61 = vld [vmem:[#allocation15 + $0xd0] sm:$0xff] }
  0xa9   :  { %3401 = vst [vmem:[#allocation41_spill] sm:$0xff] %v2960_v59  ;;  %3402 = vst [vmem:[#allocation42_spill] sm:$0xff] %v2962_v60  ;;  %v2966_v62 = vld [vmem:[#allocation15 + $0xd8] sm:$0xff]  ;;  %v2968_v63 = vld [vmem:[#allocation15 + $0xe0] sm:$0xff] }
  0xaa   :  { %3403 = vst [vmem:[#allocation43_spill] sm:$0xff] %v2964_v61  ;;  %3404 = vst [vmem:[#allocation44_spill] sm:$0xff] %v2966_v62  ;;  %v2970_v0 = vld [vmem:[#allocation15 + $0xe8] sm:$0xff]  ;;  %v2972_v52 = vld [vmem:[#allocation15 + $0xf0] sm:$0xff] }
  0xab   :  { %3405 = vst [vmem:[#allocation45_spill] sm:$0xff] %v2968_v63  ;;  %3406 = vst [vmem:[#allocation46_spill] sm:$0xff] %v2970_v0  ;;  %v2974_v55 = vld [vmem:[#allocation15 + $0xf8] sm:$0xff]  ;;  %v2241_v56 = vld [vmem:[%s3336_s1 + $0x4] ss:$16 sps:$4 sm:$0xff]  }
  0xac   :  { %3407 = vst [vmem:[#allocation47_spill] sm:$0xff] %v2972_v52  ;;  %3408 = vst [vmem:[#allocation48_spill] sm:$0xff] %v2974_v55  ;;  %v2243_v60 = vld [vmem:[%s3336_s1 + $0xc] ss:$16 sps:$4 sm:$0xff]   ;;  %215 = vmatprep.subr.bf16.mxu0 %v2241_v56  ;;  %v2245_v62 = vld [vmem:[%s3336_s1] ss:$16 sps:$4 sm:$0xff]  }
  0xad   :  { %v2246_v0 = vld [vmem:[%s3336_s1 + $0x8] ss:$16 sps:$4 sm:$0xff]   ;;  %v144_v55 = vld [vmem:[%s3335_s0] sm:$0xff]  ;;  %288 = vmatprep.subr.bf16.mxu1 %v2243_v60  ;;  %216 = vmatpush1.bf16.msra.mxu0 %v2245_v62  ;;  %v3409_v52 = vmov 0   ;;  %v146_v60 = vld [vmem:[%s3335_s0 + $0x10] sm:$0xff] }
  0xae   :  { %v145_v63 = vld [vmem:[%s3335_s0 + $0x8] sm:$0xff]  ;;  %289 = vmatpush1.bf16.msra.mxu1 %v2246_v0  ;;  %v147_v59 = vld [vmem:[%s3335_s0 + $0x18] sm:$0xff]  ;;  %v148_v0 = vld [vmem:[%s3335_s0 + $0x20] sm:$0xff] }
  0xaf   :  { %v152_v56 = vpack.c.bf16 %v145_v63, %v144_v55  ;;  %v153_v62 = vpack.c.bf16 %v147_v59, %v146_v60  ;;  %v149_v55 = vld [vmem:[%s3335_s0 + $0x28] sm:$0xff]  ;;  %v150_v59 = vld [vmem:[%s3335_s0 + $0x30] sm:$0xff] }
  0xb0   :  { %v154_v63 = vpack.c.bf16 %v149_v55, %v148_v0  ;;  %v3368_v55 = vmov 0.0  }
  0xb1   :  { %1974 = vmatmul.mubr.msk.bf16.vlgmr.msra.gmra.mrb[0].mxu0 %vm202_vm0, %v152_v56  ;;  %1978 = vmatmul.mubr.msk.bf16.vlgmr.msra.gmra.mrb[0].mxu1 %vm202_vm0, %v152_v56  ;;  %v151_v56 = vld [vmem:[%s3335_s0 + $0x38] sm:$0xff]  ;;  %476 = vst [vmem:[#allocation4] sm:$0xff] %v3368_v55  ;;  %477 = vst [vmem:[#allocation5] sm:$0xff] %v3368_v55  ;;  %s3089_s0 = smov 0  }
  0xb2   :  { %257 = vmatprep.mubr.bf16.mxu0 %v3409_v52  ;;  %330 = vmatprep.mubr.bf16.mxu1 %v3409_v52  ;;  %v155_v60 = vpack.c.bf16 %v151_v56, %v150_v59  ;;  %478 = vst [vmem:[#allocation6] sm:$0xff] %v3368_v55 }
  0xb9   :  { %1975 = vmatmul.mubr.msk.bf16.gmra.mrb[4].mxu0 %vm202_vm0, %v153_v62  ;;  %1979 = vmatmul.mubr.msk.bf16.gmra.mrb[4].mxu1 %vm202_vm0, %v153_v62  ;;  %v162_v62 = vlaneseq }
  0xba   :  { %267 = vmatprep.mubr.bf16.mxu0 %v3409_v52  ;;  %340 = vmatprep.mubr.bf16.mxu1 %v3409_v52 }
  0xbb   :  { %v3026_v0 = vand.u32 127, %v162_v62 }
  0xbd   :  { %3410 = vst [vmem:[#allocation49_spill] sm:$0xff] %v3026_v0  ;;  %vm395_vm1 = vcmp.lt.s32.totalorder %v3026_v0, 32 }
  0xc1   :  { %1976 = vmatmul.mubr.msk.bf16.gmra.mrb[8].mxu0 %vm202_vm0, %v154_v63  ;;  %1980 = vmatmul.mubr.msk.bf16.gmra.mrb[8].mxu1 %vm202_vm0, %v154_v63  ;;  %v3035_v63 = vshrl.u32 %v162_v62, 7 }
  0xc2   :  { %277 = vmatprep.mubr.bf16.mxu0 %v3409_v52  ;;  %350 = vmatprep.mubr.bf16.mxu1 %v3409_v52  ;;  %v3033_v52 = vsel %vm395_vm1, 1.0, %v3368_v55 }
  0xc3   :  { %v3374_v59 = vsub.s32 0, %v3035_v63  ;;  %v3377_v56 = vsub.s32 2, %v3035_v63  ;;  %v3380_v61 = vsub.s32 1, %v3035_v63  ;;  %v3381_v58 = vsub.s32 3, %v3035_v63 }
  0xc9   :  { %1977 = vmatmul.mubr.msk.bf16.gmra.mrb[12].mxu0 %vm202_vm0, %v155_v60  ;;  %1981 = vmatmul.mubr.msk.bf16.gmra.mrb[12].mxu1 %vm202_vm0, %v155_v60  ;;  %v160_v60 = vld [vmem:[#allocation7] sm:$0xf] }
  0xca   :  { %v3043_v57 = vrot.slane %v160_v60, %v3374_v59  ;;  %v3047_v0 = vrot.slane %v160_v60, %v3377_v56  ;;  %v3051_v62 = vrot.slane %v160_v60, %v3380_v61  ;;  %v3055_v55 = vrot.slane %v160_v60, %v3381_v58 }
 0x184   :  { %v249_v54 = vpop.f32.mrb[0].mxu0  ;;  %v322_v51 = vpop.f32.mrb[0].mxu1 }
 0x185   :  { %v250_v53 = vadd.f32 %v249_v54, %v3043_v57  ;;  %v323_v48 = vadd.f32 %v322_v51, %v3047_v0  ;;  %v251_v59 = vpop.f32.mrb[1].mxu0  ;;  %v324_v50 = vpop.f32.mrb[1].mxu1 }
 0x186   :  { %v252_v47 = vadd.f32 %v251_v59, %v3051_v62  ;;  %v325_v56 = vadd.f32 %v324_v50, %v3055_v55  ;;  %v253_v49 = vpop.f32.mrb[2].mxu0  ;;  %v326_v44 = vpop.f32.mrb[2].mxu1 }
 0x187   :  { %361 = vst [vmem:[#allocation2] sm:$0xff] %v250_v53  ;;  %363 = vst [vmem:[#allocation2 + $0x10] sm:$0xff] %v323_v48  ;;  %v254_v61 = vadd.f32 %v253_v49, %v3043_v57  ;;  %v327_v60 = vadd.f32 %v326_v44, %v3047_v0  ;;  %v255_v58 = vpop.f32.mrb[3].mxu0  ;;  %v328_v46 = vpop.f32.mrb[3].mxu1 }
 0x188   :  { %362 = vst [vmem:[#allocation2 + $0x8] sm:$0xff] %v252_v47  ;;  %364 = vst [vmem:[#allocation2 + $0x18] sm:$0xff] %v325_v56  ;;  %v256_v51 = vadd.f32 %v255_v58, %v3051_v62  ;;  %v329_v54 = vadd.f32 %v328_v46, %v3055_v55 }
 0x189   :  { %365 = vst [vmem:[#allocation2 + $0x20] sm:$0xff] %v254_v61  ;;  %367 = vst [vmem:[#allocation2 + $0x30] sm:$0xff] %v327_v60 }
 0x18a   :  { %366 = vst [vmem:[#allocation2 + $0x28] sm:$0xff] %v256_v51  ;;  %368 = vst [vmem:[#allocation2 + $0x38] sm:$0xff] %v329_v54 }
 0x18c   :  { %v259_v50 = vpop.f32.mrb[4].mxu0  ;;  %v332_v59 = vpop.f32.mrb[4].mxu1 }
 0x18d   :  { %v260_v48 = vadd.f32 %v259_v50, %v3043_v57  ;;  %v333_v49 = vadd.f32 %v332_v59, %v3047_v0  ;;  %v261_v53 = vpop.f32.mrb[5].mxu0  ;;  %v334_v44 = vpop.f32.mrb[5].mxu1 }
 0x18e   :  { %v262_v43 = vadd.f32 %v261_v53, %v3051_v62  ;;  %v335_v47 = vadd.f32 %v334_v44, %v3055_v55  ;;  %v263_v56 = vpop.f32.mrb[6].mxu0  ;;  %v336_v58 = vpop.f32.mrb[6].mxu1 }
 0x18f   :  { %369 = vst [vmem:[#allocation2 + $0x40] sm:$0xff] %v260_v48  ;;  %371 = vst [vmem:[#allocation2 + $0x50] sm:$0xff] %v333_v49  ;;  %v264_v46 = vadd.f32 %v263_v56, %v3043_v57  ;;  %v337_v61 = vadd.f32 %v336_v58, %v3047_v0  ;;  %v265_v60 = vpop.f32.mrb[7].mxu0  ;;  %v338_v51 = vpop.f32.mrb[7].mxu1 }
 0x190   :  { %370 = vst [vmem:[#allocation2 + $0x48] sm:$0xff] %v262_v43  ;;  %372 = vst [vmem:[#allocation2 + $0x58] sm:$0xff] %v335_v47  ;;  %v266_v54 = vadd.f32 %v265_v60, %v3051_v62  ;;  %v339_v50 = vadd.f32 %v338_v51, %v3055_v55 }
 0x191   :  { %373 = vst [vmem:[#allocation2 + $0x60] sm:$0xff] %v264_v46  ;;  %375 = vst [vmem:[#allocation2 + $0x70] sm:$0xff] %v337_v61 }
 0x192   :  { %374 = vst [vmem:[#allocation2 + $0x68] sm:$0xff] %v266_v54  ;;  %376 = vst [vmem:[#allocation2 + $0x78] sm:$0xff] %v339_v50 }
 0x194   :  { %v269_v59 = vpop.f32.mrb[8].mxu0  ;;  %v342_v53 = vpop.f32.mrb[8].mxu1 }
 0x195   :  { %v270_v48 = vadd.f32 %v269_v59, %v3043_v57  ;;  %v343_v49 = vadd.f32 %v342_v53, %v3047_v0  ;;  %v271_v44 = vpop.f32.mrb[9].mxu0  ;;  %v344_v56 = vpop.f32.mrb[9].mxu1 }
 0x196   :  { %v272_v58 = vadd.f32 %v271_v44, %v3051_v62  ;;  %v345_v43 = vadd.f32 %v344_v56, %v3055_v55  ;;  %v273_v47 = vpop.f32.mrb[10].mxu0  ;;  %v346_v60 = vpop.f32.mrb[10].mxu1 }
 0x197   :  { %377 = vst [vmem:[#allocation2 + $0x80] sm:$0xff] %v270_v48  ;;  %379 = vst [vmem:[#allocation2 + $0x90] sm:$0xff] %v343_v49  ;;  %v274_v46 = vadd.f32 %v273_v47, %v3043_v57  ;;  %v347_v61 = vadd.f32 %v346_v60, %v3047_v0  ;;  %v275_v51 = vpop.f32.mrb[11].mxu0  ;;  %v348_v54 = vpop.f32.mrb[11].mxu1 }
 0x198   :  { %378 = vst [vmem:[#allocation2 + $0x88] sm:$0xff] %v272_v58  ;;  %380 = vst [vmem:[#allocation2 + $0x98] sm:$0xff] %v345_v43  ;;  %v276_v50 = vadd.f32 %v275_v51, %v3051_v62  ;;  %v349_v59 = vadd.f32 %v348_v54, %v3055_v55 }
 0x199   :  { %381 = vst [vmem:[#allocation2 + $0xa0] sm:$0xff] %v274_v46  ;;  %383 = vst [vmem:[#allocation2 + $0xb0] sm:$0xff] %v347_v61 }
 0x19a   :  { %382 = vst [vmem:[#allocation2 + $0xa8] sm:$0xff] %v276_v50  ;;  %384 = vst [vmem:[#allocation2 + $0xb8] sm:$0xff] %v349_v59 }
 0x19c   :  { %v279_v53 = vpop.f32.mrb[12].mxu0  ;;  %v352_v44 = vpop.f32.mrb[12].mxu1 }
 0x19d   :  { %v280_v48 = vadd.f32 %v279_v53, %v3043_v57  ;;  %v353_v49 = vadd.f32 %v352_v44, %v3047_v0  ;;  %v281_v56 = vpop.f32.mrb[13].mxu0  ;;  %v354_v47 = vpop.f32.mrb[13].mxu1 }
 0x19e   :  { %v282_v60 = vadd.f32 %v281_v56, %v3051_v62  ;;  %v355_v58 = vadd.f32 %v354_v47, %v3055_v55  ;;  %v283_v43 = vpop.f32.mrb[14].mxu0  ;;  %v356_v51 = vpop.f32.mrb[14].mxu1 }
 0x19f   :  { %385 = vst [vmem:[#allocation2 + $0xc0] sm:$0xff] %v280_v48  ;;  %387 = vst [vmem:[#allocation2 + $0xd0] sm:$0xff] %v353_v49  ;;  %v284_v46 = vadd.f32 %v283_v43, %v3043_v57  ;;  %v357_v61 = vadd.f32 %v356_v51, %v3047_v0  ;;  %v285_v54 = vpop.f32.mrb[15].mxu0  ;;  %v358_v50 = vpop.f32.mrb[15].mxu1 }
 0x1a0   :  { %386 = vst [vmem:[#allocation2 + $0xc8] sm:$0xff] %v282_v60  ;;  %388 = vst [vmem:[#allocation2 + $0xd8] sm:$0xff] %v355_v58  ;;  %v286_v59 = vadd.f32 %v285_v54, %v3051_v62  ;;  %v359_v53 = vadd.f32 %v358_v50, %v3055_v55 }
 0x1a1   :  { %389 = vst [vmem:[#allocation2 + $0xe0] sm:$0xff] %v284_v46  ;;  %391 = vst [vmem:[#allocation2 + $0xf0] sm:$0xff] %v357_v61 }
 0x1a2   :  { %390 = vst [vmem:[#allocation2 + $0xe8] sm:$0xff] %v286_v59  ;;  %392 = vst [vmem:[#allocation2 + $0xf8] sm:$0xff] %v359_v53 }
 0x1a3 LB: > { %v3411_v3 = vld [vmem:[#allocation25_spill] sm:$0xff]  ;;  %v1992_v55 = vcombine.high %v2775_v7, %v2785_v9  ;;  %v1990_v62 = vcombine.high %v2760_v4, %v2770_v6  ;;  %v1989_v44 = vcombine.low %v2760_v4, %v2770_v6  ;;  %v1994_v48 = vcombine.high %v2780_v8, %v2790_v10  ;;  %s2111_s17 = sshll.u32 %s2541_s0, 5  ;;  %s2022_s2 = sshll.u32 %s2541_s0, 3  ;;  %s2541_s0 = sphi %s3089_s0, %s484_s0  }
 0x1a4   : > { %v1988_v57 = vcombine.high %v3411_v3, %v2765_v5  ;;  %v1987_v0 = vcombine.low %v3411_v3, %v2765_v5  ;;  %v1991_v49 = vcombine.low %v2775_v7, %v2785_v9  ;;  %v1996_v56 = vcombine.high %v2795_v11, %v2805_v13  ;;  %s489_s19 = scalar_lea.vmem [#allocation2], %s2111_s17  ;;  %s783_s21 = scalar_lea.vmem [#allocation3], %s2022_s2 }
 0x1a5   : > { %696 = vmatprep.subr.bf16.mxu1 %v1990_v62  ;;  %v1993_v47 = vcombine.low %v2780_v8, %v2790_v10  ;;  %v1998_v60 = vcombine.high %v2800_v12, %v2810_v14  ;;  %v2559_v58 = vmov 0   ;;  %v1995_v43 = vcombine.low %v2795_v11, %v2805_v13  ;;  %s484_s0 = sadd.s32 1, %s2541_s0  }
 0x1a6   : > { %655 = vmatprep.subr.bf16.mxu0 %v1988_v57  ;;  %697 = vmatpush1.bf16.msra.mxu1 %v1989_v44  ;;  %v2000_v51 = vcombine.high %v2815_v15, %v2825_v17  ;;  %v1997_v46 = vcombine.low %v2800_v12, %v2810_v14  ;;  %v2002_v61 = vcombine.high %v2820_v16, %v2830_v18  ;;  %p481_p8 = scmp.ge.s32.totalorder %s484_s0, 8  }
 0x1a7   : > { %656 = vmatpush1.bf16.msra.mxu0 %v1987_v0  ;;  %698 = vmatprep.subr.bf16.mxu1 %v1994_v48  ;;  %v1999_v54 = vcombine.low %v2815_v15, %v2825_v17  ;;  %v2004_v50 = vcombine.high %v2835_v19, %v2845_v21  ;;  %v2001_v59 = vcombine.low %v2820_v16, %v2830_v18  ;;  %vm2560_vm2 = vmmov (%p481_p8), 0   ;;  %v2272_v4 = vld [vmem:[#allocation14 + $0x20] ss:$16 sps:$4 sm:$0xff] (%p481_p8)   ;;  %v2274_v6 = vld [vmem:[#allocation14 + $0x44] ss:$16 sps:$4 sm:$0xff] (%p481_p8)  }
 0x1a8   : > { %657 = vmatprep.subr.bf16.mxu0 %v1992_v55  ;;  %687 = vmatprep.mubr.bf16.mxu0 %v2559_v58  ;;  %v2006_v53 = vcombine.high %v2840_v20, %v2850_v22  ;;  %v2003_v57 = vcombine.low %v2835_v19, %v2845_v21  ;;  %v2008_v0 = vcombine.high %v2855_v23, %v2865_v25  ;;  %v2273_v5 = vld [vmem:[%s3341_s6 + $0x10] sm:$0xff] (%p481_p8)   ;;  %v2277_v9 = vld [vmem:[%s3341_s6 + $0x18] sm:$0xff] (%p481_p8)   ;;  %v2281_v12 = vld [vmem:[%s3341_s6 + $0x20] sm:$0xff] (%p481_p8)  }
 0x1a9   : > { %728 = vmatprep.mubr.bf16.mxu1 %v2559_v58  ;;  %v2005_v55 = vcombine.low %v2840_v20, %v2850_v22  ;;  %v2010_v62 = vcombine.high %v2860_v24, %v2870_v26  ;;  %v2007_v44 = vcombine.low %v2855_v23, %v2865_v25  ;;  %v2012_v48 = vcombine.high %v2875_v27, %v2885_v29  ;;  %v2276_v7 = vld [vmem:[#allocation14 + $0x40] ss:$16 sps:$4 sm:$0xff] (%p481_p8)   ;;  %v2278_v8 = vld [vmem:[#allocation14 + $0x64] ss:$16 sps:$4 sm:$0xff] (%p481_p8)   ;;  %v2299_v25 = vld [vmem:[#allocation14 + $0xc] ss:$16 sps:$4 sm:$0xff] (%p481_p8)  }
 0x1aa   : > { %699 = vmatpush1.bf16.msra.mxu1 %v1993_v47  ;;  %v2011_v47 = vcombine.low %v2875_v27, %v2885_v29  ;;  %v2013_v58 = vcombine.low %v2880_v28, %v2890_v30  ;;  %v2280_v10 = vld [vmem:[#allocation14 + $0x60] ss:$16 sps:$4 sm:$0xff] (%p481_p8)   ;;  %v2282_v11 = vld [vmem:[#allocation14 + $0x84] ss:$16 sps:$4 sm:$0xff] (%p481_p8)   ;;  %v2297_v29 = vld [vmem:[#allocation14 + $0x8] ss:$16 sps:$4 sm:$0xff] (%p481_p8)  }
 0x1ab   : > { %658 = vmatpush1.bf16.msra.mxu0 %v1991_v49  ;;  %700 = vmatprep.subr.bf16.mxu1 %v1998_v60  ;;  %v2009_v49 = vcombine.low %v2860_v24, %v2870_v26  ;;  %v2016_v60 = vcombine.high %v2895_v31, %v2905_v33  ;;  %v2284_v13 = vld [vmem:[#allocation14 + $0x80] ss:$16 sps:$4 sm:$0xff] (%p481_p8)   ;;  %v2286_v14 = vld [vmem:[#allocation14 + $0xa4] ss:$16 sps:$4 sm:$0xff] (%p481_p8)  }
 0x1ac   : > { %659 = vmatprep.subr.bf16.mxu0 %v1996_v56  ;;  %v2014_v56 = vcombine.high %v2880_v28, %v2890_v30  ;;  %v2285_v15 = vld [vmem:[%s3341_s6 + $0x28] sm:$0xff] (%p481_p8)   ;;  %v2288_v16 = vld [vmem:[#allocation14 + $0xa0] ss:$16 sps:$4 sm:$0xff] (%p481_p8)   ;;  %v2293_v23 = vld [vmem:[%s3341_s6 + $0x38] sm:$0xff] (%p481_p8)  }
 0x1ad   :  { %v2289_v17 = vld [vmem:[%s3341_s6 + $0x30] sm:$0xff] (%p481_p8)  }
 0x1ae   : > { %701 = vmatpush1.bf16.msra.mxu1 %v1997_v46  ;;  %v485_v46 = vld [vmem:[#allocation4] sm:$0xff] }
 0x1af   : > { %660 = vmatpush1.bf16.msra.mxu0 %v1995_v43  ;;  %702 = vmatprep.subr.bf16.mxu1 %v2002_v61  ;;  %v2018_v43 = vcombine.high %v2900_v32, %v2910_v34  ;;  %v2017_v61 = vcombine.low %v2900_v32, %v2910_v34  ;;  %v2290_v18 = vld [vmem:[#allocation14 + $0xc4] ss:$16 sps:$4 sm:$0xff] (%p481_p8)   ;;  %v2292_v20 = vld [vmem:[#allocation14 + $0xc0] ss:$16 sps:$4 sm:$0xff] (%p481_p8)   ;;  %v2300_v32 = vld [vmem:[#allocation14 + $0x28] ss:$16 sps:$4 sm:$0xff] (%p481_p8)  }
 0x1b0   : > { %661 = vmatprep.subr.bf16.mxu0 %v2000_v51  ;;  %v2015_v51 = vcombine.low %v2895_v31, %v2905_v33  ;;  %v2294_v21 = vld [vmem:[#allocation14 + $0xe4] ss:$16 sps:$4 sm:$0xff] (%p481_p8)   ;;  %v2296_v24 = vld [vmem:[#allocation14 + $0xe0] ss:$16 sps:$4 sm:$0xff] (%p481_p8)   ;;  %v2302_v31 = vld [vmem:[#allocation14 + $0x2c] ss:$16 sps:$4 sm:$0xff] (%p481_p8)  }
 0x1b1   :  { %v2305_v33 = vld [vmem:[#allocation14 + $0x4c] ss:$16 sps:$4 sm:$0xff] (%p481_p8)  }
 0x1b2   : > { %703 = vmatpush1.bf16.msra.mxu1 %v2001_v59  ;;  %v491_v59 = vld [vmem:[%s489_s19 + $0x8] sm:$0xff] }
 0x1b3   : > { %662 = vmatpush1.bf16.msra.mxu0 %v1999_v54  ;;  %704 = vmatprep.subr.bf16.mxu1 %v2006_v53  ;;  %v494_v54 = vpack.c.bf16 %v485_v46, %v485_v46  ;;  %v492_v46 = vld [vmem:[%s489_s19 + $0x10] sm:$0xff] }
 0x1b4   : > { %663 = vmatprep.subr.bf16.mxu0 %v2004_v50  ;;  %v490_v50 = vld [vmem:[%s489_s19] sm:$0xff] }
 0x1b6   : > { %705 = vmatpush1.bf16.msra.mxu1 %v2005_v55 }
 0x1b7   : > { %664 = vmatpush1.bf16.msra.mxu0 %v2003_v57  ;;  %706 = vmatprep.subr.bf16.mxu1 %v2010_v62 }
 0x1b8   : > { %665 = vmatprep.subr.bf16.mxu0 %v2008_v0 }
 0x1ba   : > { %707 = vmatpush1.bf16.msra.mxu1 %v2009_v49 }
 0x1bb   : > { %666 = vmatpush1.bf16.msra.mxu0 %v2007_v44  ;;  %708 = vmatprep.subr.bf16.mxu1 %v2014_v56 }
 0x1bc   : > { %667 = vmatprep.subr.bf16.mxu0 %v2012_v48 }
 0x1be   : > { %709 = vmatpush1.bf16.msra.mxu1 %v2013_v58  ;;  %v493_v58 = vld [vmem:[%s489_s19 + $0x18] sm:$0xff] }
 0x1bf   : > { %668 = vmatpush1.bf16.msra.mxu0 %v2011_v47  ;;  %710 = vmatprep.subr.bf16.mxu1 %v2018_v43 }
 0x1c0   : > { %669 = vmatprep.subr.bf16.mxu0 %v2016_v60 }
 0x1c2   : > { %711 = vmatpush1.bf16.msra.mxu1 %v2017_v61 }
 0x1c3   : > { %670 = vmatpush1.bf16.msra.mxu0 %v2015_v51 }
 0x1c5   : > { %729 = vmatmul.mubr.bf16.vlgmr.msra.gmra.mrb[0].mxu1 %v494_v54 }
 0x1c6   : > { %688 = vmatmul.mubr.bf16.vlgmr.msra.gmra.mrb[0].mxu0 %v494_v54 }
 0x298   : > { %v730_v55 = vpop.f32.mrb[0].mxu1 }
 0x299   : > { %v689_v53 = vpop.f32.mrb[0].mxu0  ;;  %v732_v48 = vpop.f32.mrb[1].mxu1  ;;  %v739_v54 = vadd.f32 %v730_v55, %v492_v46 }
 0x29a   : > { %v737_v57 = vadd.f32 %v689_v53, %v490_v50  ;;  %v691_v0 = vpop.f32.mrb[1].mxu0  ;;  %v734_v47 = vpop.f32.mrb[2].mxu1  ;;  %v740_v51 = vadd.f32 %v732_v48, %v493_v58 }
 0x29b   : > { %v738_v62 = vadd.f32 %v691_v0, %v491_v59  ;;  %v693_v44 = vpop.f32.mrb[2].mxu0  ;;  %v735_v43 = vpop.f32.mrb[3].mxu1 }
 0x29c   : > { %v2019_v49 = vmul.f32 -1.442695, %v737_v57  ;;  %v694_v56 = vpop.f32.mrb[3].mxu0  ;;  %v2021_v61 = vmul.f32 -1.442695, %v740_v51  ;;  %v486_v44 = vld [vmem:[#allocation5] sm:$0xff] }
 0x29d   : > { %v2020_v60 = vmul.f32 -1.442695, %v738_v62 }
 0x29e   : > { %2247 = vpow2.f32 %v2019_v49 }
 0x29f   : > { %2249 = vpow2.f32 %v2020_v60 }
 0x2a0   : > { %2251 = vpow2.f32 %v2021_v61 }
 0x2a1   : > { %2253 = vtanh.f32 %v739_v54 }
 0x2a8   : > { %v2248_v3 = vpop.eup %2247 }
 0x2a9   : > { %v2250_v50 = vpop.eup %2249  ;;  %v744_v53 = vadd.f32 1.0, %v2248_v3 }
 0x2aa   : > { %v750_v59 = vadd.f32 1.0, %v2250_v50  ;;  %v2252_v57 = vpop.eup %2251 }
 0x2ab   : > { %2255 = vrcp.f32 %v744_v53  ;;  %v2254_v0 = vpop.eup %2253  ;;  %v757_v56 = vadd.f32 1.0, %v2252_v57 }
 0x2ac   : > { %2257 = vrcp.f32 %v750_v59 }
 0x2ad   : > { %2259 = vrcp.f32 %v757_v56 }
 0x2b5   : > { %v2256_v62 = vpop.eup %2255 }
 0x2b6   : > { %v2258_v47 = vpop.eup %2257  ;;  %v761_v49 = vmul.f32 %v2256_v62, %v2254_v0  ;;  %v779_v62 = vld [vmem:[#allocation6] sm:$0xff] }
 0x2b7   : > { %v760_v60 = vmul.f32 %v2258_v47, %v486_v44  ;;  %v2260_v55 = vpop.eup %2259 }
 0x2b9   : > { %v762_v48 = vadd.f32 %v761_v49, %v760_v60  ;;  %v3412_v49 = vmov (%p481_p8), 0.0   ;;  %v2265_v60 = vld [vmem:[%s3341_s6] sm:$0xff] (%p481_p8)  }
 0x2ba   :  { %2134 = vmatprep.subr.bf16.mxu0 (%p481_p8), %v3412_v49  ;;  %2150 = vmatprep.mubr.msk.bf16.mxu0 (%p481_p8), %vm2560_vm2, %v3412_v49 }
 0x2bb   : > { %786 = vst [vmem:[#allocation5] sm:$0xff] %v762_v48  ;;  %2261 = vtanh.f32 %v762_v48  ;;  %v3413_v48 = vmov (%p481_p8), 0   ;;  %2135 = vmatpush3.bf16.msra.mxu0 (%p481_p8), %v2265_v60  ;;  %v2320_v60 = vld [vmem:[#allocation14 + $0xec] ss:$16 sps:$4 sm:$0xff] (%p481_p8)  }
 0x2bc   :  { %1160 = vmatprep.mubr.bf16.mxu1 (%p481_p8), %v3413_v48  ;;  %1307 = vst [vmem:[#allocation5] sm:$0xff] (%p481_p8), %v3412_v49  ;;  %2136 = vmatprep.subr.bf16.mxu0 (%p481_p8), %v3412_v49 }
 0x2c5   : > { %v2262_v58 = vpop.eup %2261 }
 0x2c6   : > { %v764_v3 = vmul.f32 %v2262_v58, %v2260_v55  ;;  %v2266_v55 = vld [vmem:[#allocation14 + $0x4] ss:$16 sps:$4 sm:$0xff] (%p481_p8)   ;;  %v2268_v58 = vld [vmem:[#allocation14] ss:$16 sps:$4 sm:$0xff] (%p481_p8)  }
 0x2c7   :  { %1128 = vmatprep.subr.bf16.mxu1 (%p481_p8), %v2266_v55  ;;  %v2318_v55 = vld [vmem:[#allocation14 + $0xe8] ss:$16 sps:$4 sm:$0xff] (%p481_p8)  }
 0x2c8   : > { %765 = vadd.xlane.f32.xlu0 %v764_v3  ;;  %785 = vst [vmem:[#allocation4] sm:$0xff] %v764_v3  ;;  %1129 = vmatpush1.bf16.msra.mxu1 (%p481_p8), %v2268_v58  ;;  %v946_v58 = vld [vmem:[#allocation17] sm:$0xf] (%p481_p8) }
 0x2c9   :  { %1306 = vst [vmem:[#allocation4] sm:$0xff] (%p481_p8), %v3412_v49 }
 0x355   : > { %v766_v43 = vpop.xlane.xlu0 %765 }
 0x356   : > { %v767_v51 = vmul.f32 0.03125, %v766_v43 }
 0x358   : > { %v768_v46 = vsub.f32 %v764_v3, %v767_v51  ;;  %v2303_v3 = vld [vmem:[#allocation14 + $0x48] ss:$16 sps:$4 sm:$0xff] (%p481_p8)   ;;  %v2308_v51 = vld [vmem:[#allocation14 + $0x6c] ss:$16 sps:$4 sm:$0xff] (%p481_p8)  }
 0x35a   : > { %v769_v61 = vmul.f32 %v3033_v52, %v768_v46  ;;  %v2306_v46 = vld [vmem:[#allocation14 + $0x68] ss:$16 sps:$4 sm:$0xff] (%p481_p8)  }
 0x35c   : > { %v770_v54 = vmul.f32 %v769_v61, %v769_v61 }
 0x35e   : > { %771 = vadd.xlane.f32.xlu0 %v770_v54 }
 0x3eb   : > { %v772_v50 = vpop.xlane.xlu0 %771 }
 0x3ec   : > { %v773_v53 = vmul.f32 0.03125, %v772_v50 }
 0x3ee   : > { %v774_v59 = vadd.f32 1e-05, %v773_v53  ;;  %v2309_v53 = vld [vmem:[#allocation14 + $0x88] ss:$16 sps:$4 sm:$0xff] (%p481_p8)  }
 0x3f0   : > { %2263 = vrsqrt.f32 %v774_v59 }
 0x3fa   : > { %v2264_v57 = vpop.eup %2263 }
 0x3fb   : > { %v776_v0 = vmul.f32 %v2264_v57, %v769_v61  ;;  %v2311_v61 = vld [vmem:[#allocation14 + $0x8c] ss:$16 sps:$4 sm:$0xff] (%p481_p8)  }
 0x3fc   :  { %v2314_v57 = vld [vmem:[#allocation14 + $0xac] ss:$16 sps:$4 sm:$0xff] (%p481_p8)  }
 0x3fd   : > { %v777_v44 = vmul.f32 %v2748_v1, %v776_v0  ;;  %483 = sbr.rel (!%p481_p8) target bundleno = 419 (0x1a3), region = 130  ;;  %v2269_v1 = vld [vmem:[%s3341_s6 + $0x8] sm:$0xff] (%p481_p8)  }
 0x3fe   :  { %2137 = vmatpush3.bf16.msra.mxu0 (%p481_p8), %v2269_v1  ;;  %v2312_v0 = vld [vmem:[#allocation14 + $0xa8] ss:$16 sps:$4 sm:$0xff] (%p481_p8)   ;;  %v2023_v1 = vld [vmem:[#allocation12] ss:$0 sm:$0xff] (%p481_p8) }
 0x3ff   : > { %v778_v56 = vadd.f32 %v2750_v2, %v777_v44  ;;  %v2270_v2 = vld [vmem:[#allocation14 + $0x24] ss:$16 sps:$4 sm:$0xff] (%p481_p8)   ;;  %2138 = vmatprep.subr.bf16.mxu0 (%p481_p8), %v3412_v49  ;;  %v2317_v44 = vld [vmem:[#allocation14 + $0xcc] ss:$16 sps:$4 sm:$0xff] (%p481_p8)  }
 0x400   :  { %1130 = vmatprep.subr.bf16.mxu1 (%p481_p8), %v2270_v2  ;;  %v3414_v2 = vsub.s32 (%p481_p8), 0, %v3035_v63 }
 0x401   : > { %v780_v47 = vadd.f32 %v779_v62, %v778_v56  ;;  %784 = vst [vmem:[%s783_s21] sm:$0xff] %v778_v56  ;;  %1131 = vmatpush1.bf16.msra.mxu1 (%p481_p8), %v2272_v4 }
 0x402   :  { %1132 = vmatprep.subr.bf16.mxu1 (%p481_p8), %v2274_v6  ;;  %2139 = vmatpush3.bf16.msra.mxu0 (%p481_p8), %v2273_v5  ;;  %v951_v4 = vrot.slane (%p481_p8), %v946_v58, %v3414_v2  ;;  %v3415_v6 = vsub.s32 (%p481_p8), 1, %v3035_v63 }
 0x403   : > { %781 = vst [vmem:[#allocation6] sm:$0xff] %v780_v47  ;;  %2140 = vmatprep.subr.bf16.mxu0 (%p481_p8), %v3412_v49  ;;  %v2315_v47 = vld [vmem:[#allocation14 + $0xc8] ss:$16 sps:$4 sm:$0xff] (%p481_p8)  }
 0x405   :  { %1133 = vmatpush1.bf16.msra.mxu1 %v2276_v7  ;;  %v955_v7 = vrot.slane %v946_v58, %v3415_v6 }
 0x406   :  { %1134 = vmatprep.subr.bf16.mxu1 %v2278_v8  ;;  %2141 = vmatpush3.bf16.msra.mxu0 %v2277_v9 }
 0x407   :  { %2142 = vmatprep.subr.bf16.mxu0 %v3412_v49 }
 0x408   :  { %v902_v26 = vld [vmem:[#allocation3] sm:$0xff]  ;;  %v903_v27 = vld [vmem:[#allocation3 + $0x8] sm:$0xff]  ;;  %v904_v34 = vld [vmem:[#allocation3 + $0x10] sm:$0xff] }
 0x409   :  { %1135 = vmatpush1.bf16.msra.mxu1 %v2280_v10  ;;  %v3202_v30 = vpack.c.bf16 %v903_v27, %v902_v26  ;;  %v905_v52 = vld [vmem:[#allocation3 + $0x18] sm:$0xff]  ;;  %v906_v54 = vld [vmem:[#allocation3 + $0x20] sm:$0xff]  ;;  %v907_v50 = vld [vmem:[#allocation3 + $0x28] sm:$0xff] }
 0x40a   :  { %1136 = vmatprep.subr.bf16.mxu1 %v2282_v11  ;;  %2143 = vmatpush3.bf16.msra.mxu0 %v2281_v12  ;;  %v787_v19 = vld [vmem:[#allocation6] sm:$0xff]  ;;  %v911_v43 = vpack.c.bf16 %v905_v52, %v904_v34  ;;  %v912_v59 = vpack.c.bf16 %v907_v50, %v906_v54  ;;  %v909_v56 = vld [vmem:[#allocation3 + $0x38] sm:$0xff]  ;;  %v3416_v50 = vsub.s32 2, %v3035_v63 }
 0x40b   :  { %2144 = vmatprep.subr.bf16.mxu0 %v3412_v49  ;;  %v788_v22 = vmul.f32 0.125, %v787_v19  ;;  %v908_v62 = vld [vmem:[#allocation3 + $0x30] sm:$0xff] }
 0x40d   :  { %1137 = vmatpush1.bf16.msra.mxu1 %v2284_v13  ;;  %v789_v28 = vpack.c.bf16 %v788_v22, %v788_v22 }
 0x40e   :  { %1138 = vmatprep.subr.bf16.mxu1 %v2286_v14  ;;  %2145 = vmatpush3.bf16.msra.mxu0 %v2285_v15 }
 0x40f   :  { %2146 = vmatprep.subr.bf16.mxu0 %v3412_v49 }
 0x411   :  { %1139 = vmatpush1.bf16.msra.mxu1 %v2288_v16 }
 0x412   :  { %1140 = vmatprep.subr.bf16.mxu1 %v2290_v18  ;;  %2147 = vmatpush3.bf16.msra.mxu0 %v2289_v17 }
 0x413   :  { %2148 = vmatprep.subr.bf16.mxu0 %v3412_v49  ;;  %v913_v49 = vpack.c.bf16 %v909_v56, %v908_v62 }
 0x415   :  { %1141 = vmatpush1.bf16.msra.mxu1 %v2292_v20 }
 0x416   :  { %1142 = vmatprep.subr.bf16.mxu1 %v2294_v21  ;;  %2149 = vmatpush3.bf16.msra.mxu0 %v2293_v23 }
 0x417   :  { %1201 = vmatprep.subr.bf16.mxu0 %v2299_v25 }
 0x419   :  { %1143 = vmatpush1.bf16.msra.mxu1 %v2296_v24  ;;  %2151 = vmatmul.mubr.bf16.vlgmr.msra.gmra.mrb[0].mxu0 %v789_v28 }
 0x41a   :  { %2178 = vmatprep.subr.bf16.mxu1 %v2299_v25  ;;  %1202 = vmatpush1.bf16.msra.mxu0 %v2297_v29 }
 0x41b   :  { %1233 = vmatprep.mubr.bf16.mxu0 %v3413_v48  ;;  %1203 = vmatprep.subr.bf16.mxu0 %v2302_v31 }
 0x41c   :  { %1161 = vmatmul.mubr.bf16.vlgmr.msra.gmra.mrb[0].mxu1 %v3202_v30 }
 0x41d   :  { %2186 = vmatpush1.bf16.msra.mxu1 %v2297_v29  ;;  %1170 = vmatprep.mubr.bf16.mxu1 %v3413_v48 }
 0x41e   :  { %2179 = vmatprep.subr.bf16.mxu1 %v2302_v31  ;;  %1204 = vmatpush1.bf16.msra.mxu0 %v2300_v32 }
 0x41f   :  { %1205 = vmatprep.subr.bf16.mxu0 %v2305_v33 }
 0x421   :  { %2187 = vmatpush1.bf16.msra.mxu1 %v2300_v32 }
 0x422   :  { %2180 = vmatprep.subr.bf16.mxu1 %v2305_v33  ;;  %1206 = vmatpush1.bf16.msra.mxu0 %v2303_v3 }
 0x423   :  { %1207 = vmatprep.subr.bf16.mxu0 %v2308_v51 }
 0x424   :  { %1171 = vmatmul.mubr.bf16.gmra.mrb[4].mxu1 %v911_v43 }
 0x425   :  { %2188 = vmatpush1.bf16.msra.mxu1 %v2303_v3  ;;  %1180 = vmatprep.mubr.bf16.mxu1 %v3413_v48 }
 0x426   :  { %2181 = vmatprep.subr.bf16.mxu1 %v2308_v51  ;;  %1208 = vmatpush1.bf16.msra.mxu0 %v2306_v46 }
 0x427   :  { %1209 = vmatprep.subr.bf16.mxu0 %v2311_v61 }
 0x429   :  { %2189 = vmatpush1.bf16.msra.mxu1 %v2306_v46 }
 0x42a   :  { %2182 = vmatprep.subr.bf16.mxu1 %v2311_v61  ;;  %1210 = vmatpush1.bf16.msra.mxu0 %v2309_v53 }
 0x42b   :  { %1211 = vmatprep.subr.bf16.mxu0 %v2314_v57 }
 0x42c   :  { %1181 = vmatmul.mubr.bf16.gmra.mrb[8].mxu1 %v912_v59 }
 0x42d   :  { %2190 = vmatpush1.bf16.msra.mxu1 %v2309_v53  ;;  %1190 = vmatprep.mubr.bf16.mxu1 %v3413_v48  ;;  %v959_v53 = vrot.slane %v946_v58, %v3416_v50 }
 0x42e   :  { %2183 = vmatprep.subr.bf16.mxu1 %v2314_v57  ;;  %1212 = vmatpush1.bf16.msra.mxu0 %v2312_v0  ;;  %v3417_v57 = vsub.s32 3, %v3035_v63 }
 0x42f   :  { %1213 = vmatprep.subr.bf16.mxu0 %v2317_v44 }
 0x431   :  { %2191 = vmatpush1.bf16.msra.mxu1 %v2312_v0  ;;  %v963_v0 = vrot.slane %v946_v58, %v3417_v57 }
 0x432   :  { %2184 = vmatprep.subr.bf16.mxu1 %v2317_v44  ;;  %1214 = vmatpush1.bf16.msra.mxu0 %v2315_v47 }
 0x433   :  { %1215 = vmatprep.subr.bf16.mxu0 %v2320_v60 }
 0x434   :  { %1191 = vmatmul.mubr.bf16.gmra.mrb[12].mxu1 %v913_v49 }
 0x435   :  { %2192 = vmatpush1.bf16.msra.mxu1 %v2315_v47  ;;  %1253 = vmatprep.mubr.bf16.mxu1 %v3413_v48 }
 0x436   :  { %2185 = vmatprep.subr.bf16.mxu1 %v2320_v60  ;;  %1216 = vmatpush1.bf16.msra.mxu0 %v2318_v55 }
 0x439   :  { %2193 = vmatpush1.bf16.msra.mxu1 %v2318_v55  ;;  %1234 = vmatmul.mubr.bf16.vlgmr.msra.gmra.mrb[4].mxu0 %v3202_v30 }
 0x43a   :  { %1243 = vmatprep.mubr.bf16.mxu0 %v3413_v48 }
 0x43c   :  { %1254 = vmatmul.mubr.bf16.vlgmr.msra.gmra.mrb[16].mxu1 %v912_v59 }
 0x43d   :  { %1263 = vmatprep.mubr.bf16.mxu1 %v3413_v48 }
 0x441   :  { %1244 = vmatmul.mubr.bf16.gmra.mrb[8].mxu0 %v911_v43 }
 0x444   :  { %1264 = vmatmul.mubr.bf16.gmra.mrb[20].mxu1 %v913_v49 }
 0x4ec   :  { %v895_v5 = vpop.f32.mrb[0].mxu0 }
 0x4ed   :  { %v896_v8 = vadd.f32 %v2023_v1, %v895_v5  ;;  %v2152_v9 = vpop.f32.mrb[1].mxu0 }
 0x4ee   :  { %v898_v11 = vpop.f32.mrb[2].mxu0 }
 0x4ef   :  { %v1162_v10 = vpop.f32.mrb[0].mxu1  ;;  %901 = vst [vmem:[%s3348_s13] sm:$0xff] %v896_v8  ;;  %v2153_v13 = vpop.f32.mrb[3].mxu0  ;;  %s3224_s13 = smov 0  }
 0x4f0   :  { %v1163_v48 = vadd.f32 %v1162_v10, %v951_v4  ;;  %v1164_v12 = vpop.f32.mrb[1].mxu1 }
 0x4f1   :  { %v1165_v14 = vadd.f32 %v1164_v12, %v955_v7  ;;  %v1166_v15 = vpop.f32.mrb[2].mxu1 }
 0x4f2   :  { %1274 = vst [vmem:[#allocation2] sm:$0xff] %v1163_v48  ;;  %v1167_v16 = vadd.f32 %v1166_v15, %v951_v4  ;;  %v1168_v17 = vpop.f32.mrb[3].mxu1 }
 0x4f3   :  { %1275 = vst [vmem:[#allocation2 + $0x8] sm:$0xff] %v1165_v14  ;;  %v1169_v18 = vadd.f32 %v1168_v17, %v955_v7 }
 0x4f4   :  { %1278 = vst [vmem:[#allocation2 + $0x20] sm:$0xff] %v1167_v16 }
 0x4f5   :  { %1279 = vst [vmem:[#allocation2 + $0x28] sm:$0xff] %v1169_v18 }
 0x4f7   :  { %v1172_v19 = vpop.f32.mrb[4].mxu1 }
 0x4f8   :  { %v1173_v20 = vadd.f32 %v1172_v19, %v951_v4  ;;  %v1174_v21 = vpop.f32.mrb[5].mxu1 }
 0x4f9   :  { %v1175_v22 = vadd.f32 %v1174_v21, %v955_v7  ;;  %v1176_v23 = vpop.f32.mrb[6].mxu1 }
 0x4fa   :  { %1282 = vst [vmem:[#allocation2 + $0x40] sm:$0xff] %v1173_v20  ;;  %v1177_v24 = vadd.f32 %v1176_v23, %v951_v4  ;;  %v1178_v25 = vpop.f32.mrb[7].mxu1 }
 0x4fb   :  { %1283 = vst [vmem:[#allocation2 + $0x48] sm:$0xff] %v1175_v22  ;;  %v1179_v26 = vadd.f32 %v1178_v25, %v955_v7 }
 0x4fc   :  { %1286 = vst [vmem:[#allocation2 + $0x60] sm:$0xff] %v1177_v24 }
 0x4fd   :  { %1287 = vst [vmem:[#allocation2 + $0x68] sm:$0xff] %v1179_v26 }
 0x4ff   :  { %v1182_v27 = vpop.f32.mrb[8].mxu1 }
 0x500   :  { %v1183_v28 = vadd.f32 %v1182_v27, %v951_v4  ;;  %v1184_v29 = vpop.f32.mrb[9].mxu1 }
 0x501   :  { %v1185_v30 = vadd.f32 %v1184_v29, %v955_v7  ;;  %v1186_v31 = vpop.f32.mrb[10].mxu1 }
 0x502   :  { %1290 = vst [vmem:[#allocation2 + $0x80] sm:$0xff] %v1183_v28  ;;  %v1187_v32 = vadd.f32 %v1186_v31, %v951_v4  ;;  %v1188_v33 = vpop.f32.mrb[11].mxu1 }
 0x503   :  { %1291 = vst [vmem:[#allocation2 + $0x88] sm:$0xff] %v1185_v30  ;;  %v1189_v34 = vadd.f32 %v1188_v33, %v955_v7 }
 0x504   :  { %1294 = vst [vmem:[#allocation2 + $0xa0] sm:$0xff] %v1187_v32 }
 0x505   :  { %1295 = vst [vmem:[#allocation2 + $0xa8] sm:$0xff] %v1189_v34 }
 0x507   :  { %v1192_v52 = vpop.f32.mrb[12].mxu1 }
 0x508   :  { %v1193_v3 = vadd.f32 %v1192_v52, %v951_v4  ;;  %v1194_v43 = vpop.f32.mrb[13].mxu1 }
 0x509   :  { %v1195_v51 = vadd.f32 %v1194_v43, %v955_v7  ;;  %v1196_v46 = vpop.f32.mrb[14].mxu1 }
 0x50a   :  { %1298 = vst [vmem:[#allocation2 + $0xc0] sm:$0xff] %v1193_v3  ;;  %v1197_v61 = vadd.f32 %v1196_v46, %v951_v4  ;;  %v1198_v54 = vpop.f32.mrb[15].mxu1 }
 0x50b   :  { %1299 = vst [vmem:[#allocation2 + $0xc8] sm:$0xff] %v1195_v51  ;;  %v1199_v59 = vadd.f32 %v1198_v54, %v955_v7 }
 0x50c   :  { %1302 = vst [vmem:[#allocation2 + $0xe0] sm:$0xff] %v1197_v61  ;;  %v1235_v44 = vpop.f32.mrb[4].mxu0 }
 0x50d   :  { %1303 = vst [vmem:[#allocation2 + $0xe8] sm:$0xff] %v1199_v59  ;;  %v1236_v62 = vadd.f32 %v1235_v44, %v959_v53  ;;  %v1237_v56 = vpop.f32.mrb[5].mxu0 }
 0x50e   :  { %v1238_v47 = vadd.f32 %v1237_v56, %v963_v0  ;;  %v1239_v60 = vpop.f32.mrb[6].mxu0 }
 0x50f   :  { %v1255_v49 = vpop.f32.mrb[16].mxu1  ;;  %1276 = vst [vmem:[#allocation2 + $0x10] sm:$0xff] %v1236_v62  ;;  %v1240_v1 = vadd.f32 %v1239_v60, %v959_v53  ;;  %v1241_v4 = vpop.f32.mrb[7].mxu0 }
 0x510   :  { %v1256_v55 = vadd.f32 %v1255_v49, %v959_v53  ;;  %v1257_v2 = vpop.f32.mrb[17].mxu1  ;;  %1277 = vst [vmem:[#allocation2 + $0x18] sm:$0xff] %v1238_v47  ;;  %v1242_v6 = vadd.f32 %v1241_v4, %v963_v0 }
 0x511   :  { %v1258_v5 = vadd.f32 %v1257_v2, %v963_v0  ;;  %v1259_v7 = vpop.f32.mrb[18].mxu1  ;;  %1280 = vst [vmem:[#allocation2 + $0x30] sm:$0xff] %v1240_v1 }
 0x512   :  { %1292 = vst [vmem:[#allocation2 + $0x90] sm:$0xff] %v1256_v55  ;;  %v1260_v58 = vadd.f32 %v1259_v7, %v959_v53  ;;  %v1261_v8 = vpop.f32.mrb[19].mxu1  ;;  %1281 = vst [vmem:[#allocation2 + $0x38] sm:$0xff] %v1242_v6 }
 0x513   :  { %1293 = vst [vmem:[#allocation2 + $0x98] sm:$0xff] %v1258_v5  ;;  %v1262_v9 = vadd.f32 %v1261_v8, %v963_v0 }
 0x514   :  { %1296 = vst [vmem:[#allocation2 + $0xb0] sm:$0xff] %v1260_v58  ;;  %v1245_v10 = vpop.f32.mrb[8].mxu0 }
 0x515   :  { %1297 = vst [vmem:[#allocation2 + $0xb8] sm:$0xff] %v1262_v9  ;;  %v1246_v11 = vadd.f32 %v1245_v10, %v959_v53  ;;  %v1247_v48 = vpop.f32.mrb[9].mxu0 }
 0x516   :  { %v1248_v12 = vadd.f32 %v1247_v48, %v963_v0  ;;  %v1249_v14 = vpop.f32.mrb[10].mxu0 }
 0x517   :  { %v1265_v13 = vpop.f32.mrb[20].mxu1  ;;  %1284 = vst [vmem:[#allocation2 + $0x50] sm:$0xff] %v1246_v11  ;;  %v1250_v16 = vadd.f32 %v1249_v14, %v959_v53  ;;  %v1251_v18 = vpop.f32.mrb[11].mxu0 }
 0x518   :  { %v1266_v15 = vadd.f32 %v1265_v13, %v959_v53  ;;  %v1267_v17 = vpop.f32.mrb[21].mxu1  ;;  %1285 = vst [vmem:[#allocation2 + $0x58] sm:$0xff] %v1248_v12  ;;  %v1252_v20 = vadd.f32 %v1251_v18, %v963_v0 }
 0x519   :  { %v1268_v19 = vadd.f32 %v1267_v17, %v963_v0  ;;  %v1269_v21 = vpop.f32.mrb[22].mxu1  ;;  %1288 = vst [vmem:[#allocation2 + $0x70] sm:$0xff] %v1250_v16 }
 0x51a   :  { %1300 = vst [vmem:[#allocation2 + $0xd0] sm:$0xff] %v1266_v15  ;;  %v1270_v22 = vadd.f32 %v1269_v21, %v959_v53  ;;  %v1271_v23 = vpop.f32.mrb[23].mxu1  ;;  %1289 = vst [vmem:[#allocation2 + $0x78] sm:$0xff] %v1252_v20 }
 0x51b   :  { %1301 = vst [vmem:[#allocation2 + $0xd8] sm:$0xff] %v1268_v19  ;;  %v1272_v24 = vadd.f32 %v1271_v23, %v963_v0 }
 0x51c   :  { %1304 = vst [vmem:[#allocation2 + $0xf0] sm:$0xff] %v1270_v22 }
 0x51d   :  { %1305 = vst [vmem:[#allocation2 + $0xf8] sm:$0xff] %v1272_v24 }
 0x51e LB: > { %v2067_v25 = vcombine.high %v2912_v35, %v2916_v37  ;;  %v2066_v26 = vcombine.low %v2912_v35, %v2916_v37  ;;  %v2071_v27 = vcombine.high %v2920_v39, %v2924_v41  ;;  %v2069_v28 = vcombine.high %v2914_v36, %v2918_v38  ;;  %v3418_v32 = vld [vmem:[#allocation26_spill] sm:$0xff]  ;;  %v3419_v52 = vld [vmem:[#allocation28_spill] sm:$0xff]  ;;  %v3420_v3 = vld [vmem:[#allocation27_spill] sm:$0xff]  ;;  %s2112_s24 = sshll.u32 %s2545_s13, 5  ;;  %s2101_s16 = sshll.u32 %s2545_s13, 3  ;;  %s2545_s13 = sphi %s3224_s13, %s1313_s13  }
 0x51f   : > { %v2068_v29 = vcombine.low %v2914_v36, %v2918_v38  ;;  %v2073_v30 = vcombine.high %v2922_v40, %v2926_v42  ;;  %v2070_v31 = vcombine.low %v2920_v39, %v2924_v41  ;;  %v2075_v33 = vcombine.high %v3418_v32, %v2932_v45  ;;  %v3421_v61 = vld [vmem:[#allocation31_spill] sm:$0xff]  ;;  %v3422_v54 = vld [vmem:[#allocation29_spill] sm:$0xff]  ;;  %v3423_v59 = vld [vmem:[#allocation32_spill] sm:$0xff]  ;;  %s1318_s8 = scalar_lea.vmem [#allocation2], %s2112_s24  ;;  %s1597_s20 = scalar_lea.vmem [#allocation3], %s2101_s16 }
 0x520   : > { %1484 = vmatprep.subr.bf16.mxu0 %v2067_v25  ;;  %1525 = vmatprep.subr.bf16.mxu1 %v2069_v28  ;;  %v2072_v34 = vcombine.low %v2922_v40, %v2926_v42  ;;  %v2077_v43 = vcombine.high %v3420_v3, %v3419_v52  ;;  %v2561_v51 = vmov 0   ;;  %v2074_v46 = vcombine.low %v3418_v32, %v2932_v45  ;;  %v3424_v57 = vld [vmem:[#allocation30_spill] sm:$0xff]  ;;  %v3425_v62 = vld [vmem:[#allocation35_spill] sm:$0xff]  ;;  %v3426_v56 = vld [vmem:[#allocation33_spill] sm:$0xff]  ;;  %s1313_s13 = sadd.s32 1, %s2545_s13  }
 0x521   : > { %1485 = vmatpush1.bf16.msra.mxu0 %v2066_v26  ;;  %1526 = vmatpush1.bf16.msra.mxu1 %v2068_v29  ;;  %v2079_v50 = vcombine.high %v3422_v54, %v3421_v61  ;;  %v2076_v53 = vcombine.low %v3420_v3, %v3419_v52  ;;  %v2081_v0 = vcombine.high %v3424_v57, %v3423_v59  ;;  %v3427_v60 = vld [vmem:[#allocation36_spill] sm:$0xff]  ;;  %v3428_v55 = vld [vmem:[#allocation34_spill] sm:$0xff]  ;;  %v3429_v4 = vld [vmem:[#allocation39_spill] sm:$0xff]  ;;  %p1310_p9 = scmp.ge.s32.totalorder %s1313_s13, 8  }
 0x522   : > { %1486 = vmatprep.subr.bf16.mxu0 %v2071_v27  ;;  %1527 = vmatprep.subr.bf16.mxu1 %v2073_v30  ;;  %v2078_v44 = vcombine.low %v3422_v54, %v3421_v61  ;;  %v2083_v47 = vcombine.high %v3426_v56, %v3425_v62  ;;  %v2080_v49 = vcombine.low %v3424_v57, %v3423_v59  ;;  %v3430_v5 = vld [vmem:[#allocation37_spill] sm:$0xff]  ;;  %v3431_v58 = vld [vmem:[#allocation40_spill] sm:$0xff]  ;;  %v3432_v8 = vld [vmem:[#allocation38_spill] sm:$0xff] }
 0x523   : > { %1516 = vmatprep.mubr.bf16.mxu0 %v2561_v51  ;;  %1557 = vmatprep.mubr.bf16.mxu1 %v2561_v51  ;;  %v2085_v1 = vcombine.high %v3428_v55, %v3427_v60  ;;  %v2082_v2 = vcombine.low %v3426_v56, %v3425_v62  ;;  %v2087_v6 = vcombine.high %v3430_v5, %v3429_v4  ;;  %v3433_v11 = vld [vmem:[#allocation43_spill] sm:$0xff]  ;;  %v3434_v48 = vld [vmem:[#allocation41_spill] sm:$0xff]  ;;  %v3435_v14 = vld [vmem:[#allocation44_spill] sm:$0xff] }
 0x524   : > { %v2084_v7 = vcombine.low %v3428_v55, %v3427_v60  ;;  %v2089_v9 = vcombine.high %v3432_v8, %v3431_v58  ;;  %v2086_v10 = vcombine.low %v3430_v5, %v3429_v4  ;;  %v2091_v12 = vcombine.high %v3434_v48, %v3433_v11  ;;  %v3436_v15 = vld [vmem:[#allocation42_spill] sm:$0xff]  ;;  %v3437_v18 = vld [vmem:[#allocation47_spill] sm:$0xff]  ;;  %v3438_v19 = vld [vmem:[#allocation45_spill] sm:$0xff] }
 0x525   : > { %1487 = vmatpush1.bf16.msra.mxu0 %v2070_v31  ;;  %1528 = vmatpush1.bf16.msra.mxu1 %v2072_v34  ;;  %v2088_v13 = vcombine.low %v3432_v8, %v3431_v58  ;;  %v2093_v16 = vcombine.high %v3436_v15, %v3435_v14  ;;  %v2090_v17 = vcombine.low %v3434_v48, %v3433_v11  ;;  %v3439_v22 = vld [vmem:[#allocation48_spill] sm:$0xff]  ;;  %v3440_v23 = vld [vmem:[#allocation46_spill] sm:$0xff]  ;;  %v1320_v30 = vld [vmem:[%s1318_s8 + $0x8] sm:$0xff] }
 0x526   : > { %1488 = vmatprep.subr.bf16.mxu0 %v2075_v33  ;;  %1529 = vmatprep.subr.bf16.mxu1 %v2077_v43  ;;  %v2095_v20 = vcombine.high %v3438_v19, %v3437_v18  ;;  %v2092_v21 = vcombine.low %v3436_v15, %v3435_v14  ;;  %v2097_v24 = vcombine.high %v3440_v23, %v3439_v22  ;;  %v1314_v26 = vld [vmem:[#allocation4] sm:$0xff]  ;;  %v2340_v35 = vld [vmem:[%s3346_s11 + $0x18] sm:$0xff] (%p1310_p9)   ;;  %v2342_v45 = vld [vmem:[%s3346_s11 + $0x28] sm:$0xff] (%p1310_p9)  }
 0x527   : > { %v2094_v25 = vcombine.low %v3438_v19, %v3437_v18  ;;  %v2096_v27 = vcombine.low %v3440_v23, %v3439_v22  ;;  %v1323_v28 = vpack.c.bf16 %v1314_v26, %v1314_v26  ;;  %v1319_v29 = vld [vmem:[%s1318_s8] sm:$0xff]  ;;  %v2343_v32 = vld [vmem:[%s3346_s11 + $0x30] sm:$0xff] (%p1310_p9)   ;;  %v2344_v52 = vld [vmem:[%s3346_s11 + $0x38] sm:$0xff] (%p1310_p9)  }
 0x528   :  { %v2341_v42 = vld [vmem:[%s3346_s11 + $0x20] sm:$0xff] (%p1310_p9)  }
 0x529   : > { %1489 = vmatpush1.bf16.msra.mxu0 %v2074_v46  ;;  %1530 = vmatpush1.bf16.msra.mxu1 %v2076_v53  ;;  %v2102_v56 = vld [vmem:[#allocation18] ss:$0 sm:$0xff] (%p1310_p9) }
 0x52a   : > { %1490 = vmatprep.subr.bf16.mxu0 %v2079_v50  ;;  %1531 = vmatprep.subr.bf16.mxu1 %v2081_v0 }
 0x52d   : > { %1491 = vmatpush1.bf16.msra.mxu0 %v2078_v44  ;;  %1532 = vmatpush1.bf16.msra.mxu1 %v2080_v49  ;;  %v1322_v49 = vld [vmem:[%s1318_s8 + $0x18] sm:$0xff] }
 0x52e   : > { %1492 = vmatprep.subr.bf16.mxu0 %v2083_v47  ;;  %1533 = vmatprep.subr.bf16.mxu1 %v2085_v1 }
 0x531   : > { %1493 = vmatpush1.bf16.msra.mxu0 %v2082_v2  ;;  %1534 = vmatpush1.bf16.msra.mxu1 %v2084_v7 }
 0x532   : > { %1494 = vmatprep.subr.bf16.mxu0 %v2087_v6  ;;  %1535 = vmatprep.subr.bf16.mxu1 %v2089_v9  ;;  %v1321_v6 = vld [vmem:[%s1318_s8 + $0x10] sm:$0xff] }
 0x535   : > { %1495 = vmatpush1.bf16.msra.mxu0 %v2086_v10  ;;  %1536 = vmatpush1.bf16.msra.mxu1 %v2088_v13 }
 0x536   : > { %1496 = vmatprep.subr.bf16.mxu0 %v2091_v12  ;;  %1537 = vmatprep.subr.bf16.mxu1 %v2093_v16 }
 0x539   : > { %1497 = vmatpush1.bf16.msra.mxu0 %v2090_v17  ;;  %1538 = vmatpush1.bf16.msra.mxu1 %v2092_v21  ;;  %v1315_v21 = vld [vmem:[#allocation5] sm:$0xff] }
 0x53a   : > { %1498 = vmatprep.subr.bf16.mxu0 %v2095_v20  ;;  %1539 = vmatprep.subr.bf16.mxu1 %v2097_v24 }
 0x53d   : > { %1499 = vmatpush1.bf16.msra.mxu0 %v2094_v25  ;;  %1540 = vmatpush1.bf16.msra.mxu1 %v2096_v27 }
 0x540   : > { %1517 = vmatmul.mubr.bf16.vlgmr.msra.gmra.mrb[0].mxu0 %v1323_v28  ;;  %1558 = vmatmul.mubr.bf16.vlgmr.msra.gmra.mrb[0].mxu1 %v1323_v28 }
 0x613   : > { %v1518_v31 = vpop.f32.mrb[0].mxu0  ;;  %v1559_v43 = vpop.f32.mrb[0].mxu1 }
 0x614   : > { %v1566_v33 = vadd.f32 %v1518_v31, %v1319_v29  ;;  %v1520_v34 = vpop.f32.mrb[1].mxu0  ;;  %v1561_v50 = vpop.f32.mrb[1].mxu1  ;;  %v1568_v9 = vadd.f32 %v1559_v43, %v1321_v6  ;;  %v2338_v43 = vld [vmem:[%s3346_s11 + $0x8] sm:$0xff] (%p1310_p9)  }
 0x615   : > { %v1567_v51 = vadd.f32 %v1520_v34, %v1320_v30  ;;  %v1522_v46 = vpop.f32.mrb[2].mxu0  ;;  %v1563_v44 = vpop.f32.mrb[2].mxu1  ;;  %v1569_v2 = vadd.f32 %v1561_v50, %v1322_v49  ;;  %v2337_v34 = vld [vmem:[%s3346_s11] sm:$0xff] (%p1310_p9)  }
 0x616   : > { %v2098_v53 = vmul.f32 -1.442695, %v1566_v33  ;;  %v1523_v0 = vpop.f32.mrb[3].mxu0  ;;  %v1564_v1 = vpop.f32.mrb[3].mxu1  ;;  %2154 = vmatprep.subr.bf16.mxu0 (%p1310_p9), %v2337_v34  ;;  %2194 = vmatprep.subr.bf16.mxu1 (%p1310_p9), %v2337_v34  ;;  %v3441_v44 = vld [vmem:[#allocation49_spill] sm:$0xff] (%p1310_p9) }
 0x617   : > { %v2099_v47 = vmul.f32 -1.442695, %v1567_v51  ;;  %v2100_v7 = vmul.f32 -1.442695, %v1569_v2  ;;  %2155 = vmatpush3.bf16.msra.mxu0 (%p1310_p9), %v2337_v34  ;;  %2202 = vmatpush3.bf16.msra.mxu1 (%p1310_p9), %v2337_v34  ;;  %v2339_v51 = vld [vmem:[%s3346_s11 + $0x10] sm:$0xff] (%p1310_p9)  }
 0x618   : > { %2321 = vpow2.f32 %v2098_v53  ;;  %2156 = vmatprep.subr.bf16.mxu0 (%p1310_p9), %v2338_v43  ;;  %2195 = vmatprep.subr.bf16.mxu1 (%p1310_p9), %v2338_v43 }
 0x619   : > { %2323 = vpow2.f32 %v2099_v47 }
 0x61a   : > { %2325 = vpow2.f32 %v2100_v7 }
 0x61b   : > { %2327 = vtanh.f32 %v1568_v9  ;;  %2157 = vmatpush3.bf16.msra.mxu0 (%p1310_p9), %v2338_v43  ;;  %2203 = vmatpush3.bf16.msra.mxu1 (%p1310_p9), %v2338_v43 }
 0x61c   :  { %2158 = vmatprep.subr.bf16.mxu0 (%p1310_p9), %v2339_v51  ;;  %2196 = vmatprep.subr.bf16.mxu1 (%p1310_p9), %v2339_v51 }
 0x61f   :  { %2159 = vmatpush3.bf16.msra.mxu0 (%p1310_p9), %v2339_v51  ;;  %2204 = vmatpush3.bf16.msra.mxu1 (%p1310_p9), %v2339_v51 }
 0x620   :  { %2160 = vmatprep.subr.bf16.mxu0 (%p1310_p9), %v2340_v35  ;;  %2197 = vmatprep.subr.bf16.mxu1 (%p1310_p9), %v2340_v35 }
 0x622   : > { %v2322_v10 = vpop.eup %2321 }
 0x623   : > { %v2324_v12 = vpop.eup %2323  ;;  %v1573_v13 = vadd.f32 1.0, %v2322_v10  ;;  %2161 = vmatpush3.bf16.msra.mxu0 (%p1310_p9), %v2340_v35  ;;  %2205 = vmatpush3.bf16.msra.mxu1 (%p1310_p9), %v2340_v35 }
 0x624   : > { %v1579_v16 = vadd.f32 1.0, %v2324_v12  ;;  %v2326_v17 = vpop.eup %2325  ;;  %2162 = vmatprep.subr.bf16.mxu0 (%p1310_p9), %v2341_v42  ;;  %2198 = vmatprep.subr.bf16.mxu1 (%p1310_p9), %v2341_v42 }
 0x625   : > { %2329 = vrcp.f32 %v1573_v13  ;;  %v2328_v20 = vpop.eup %2327  ;;  %v1586_v25 = vadd.f32 1.0, %v2326_v17 }
 0x626   : > { %2331 = vrcp.f32 %v1579_v16 }
 0x627   : > { %2333 = vrcp.f32 %v1586_v25  ;;  %2163 = vmatpush3.bf16.msra.mxu0 (%p1310_p9), %v2341_v42  ;;  %2206 = vmatpush3.bf16.msra.mxu1 (%p1310_p9), %v2341_v42 }
 0x628   :  { %2164 = vmatprep.subr.bf16.mxu0 (%p1310_p9), %v2342_v45  ;;  %2199 = vmatprep.subr.bf16.mxu1 (%p1310_p9), %v2342_v45 }
 0x62b   :  { %2165 = vmatpush3.bf16.msra.mxu0 (%p1310_p9), %v2342_v45  ;;  %2207 = vmatpush3.bf16.msra.mxu1 (%p1310_p9), %v2342_v45 }
 0x62c   :  { %2166 = vmatprep.subr.bf16.mxu0 (%p1310_p9), %v2343_v32  ;;  %2200 = vmatprep.subr.bf16.mxu1 (%p1310_p9), %v2343_v32 }
 0x62f   : > { %v2330_v24 = vpop.eup %2329  ;;  %2167 = vmatpush3.bf16.msra.mxu0 (%p1310_p9), %v2343_v32  ;;  %2208 = vmatpush3.bf16.msra.mxu1 (%p1310_p9), %v2343_v32 }
 0x630   : > { %v2332_v26 = vpop.eup %2331  ;;  %v1590_v27 = vmul.f32 %v2330_v24, %v2328_v20  ;;  %2168 = vmatprep.subr.bf16.mxu0 (%p1310_p9), %v2344_v52  ;;  %2201 = vmatprep.subr.bf16.mxu1 (%p1310_p9), %v2344_v52 }
 0x631   : > { %v1589_v28 = vmul.f32 %v2332_v26, %v1315_v21  ;;  %v2334_v30 = vpop.eup %2333 }
 0x633   : > { %v1591_v29 = vadd.f32 %v1590_v27, %v1589_v28  ;;  %2169 = vmatpush3.bf16.msra.mxu0 (%p1310_p9), %v2344_v52  ;;  %2209 = vmatpush3.bf16.msra.mxu1 (%p1310_p9), %v2344_v52 }
 0x635   : > { %2335 = vtanh.f32 %v1591_v29  ;;  %1595 = vst [vmem:[#allocation5] sm:$0xff] %v1591_v29 }
 0x63c   :  { %1312 = sbr.rel (!%p1310_p9) target bundleno = 1310 (0x51e), region = 141 }
 0x63f   : > { %v2336_v31 = vpop.eup %2335 }
 0x640   : > { %v1593_v33 = vmul.f32 %v2336_v31, %v2334_v30 }
 0x642   : > { %1594 = vst [vmem:[#allocation4] sm:$0xff] %v1593_v33  ;;  %1598 = vst [vmem:[%s1597_s20] sm:$0xff] %v1593_v33 }
 0x649   :  { %v1599_v36 = vld [vmem:[#allocation3] sm:$0xff]  ;;  %v1600_v37 = vld [vmem:[#allocation3 + $0x8] sm:$0xff]  ;;  %v1601_v3 = vld [vmem:[#allocation3 + $0x10] sm:$0xff] }
 0x64a   :  { %v1607_v38 = vpack.c.bf16 %v1600_v37, %v1599_v36  ;;  %v1603_v39 = vld [vmem:[#allocation3 + $0x20] sm:$0xff]  ;;  %v1604_v40 = vld [vmem:[#allocation3 + $0x28] sm:$0xff]  ;;  %v1602_v61 = vld [vmem:[#allocation3 + $0x18] sm:$0xff] }
 0x64b   :  { %v1609_v41 = vpack.c.bf16 %v1604_v40, %v1603_v39  ;;  %v1605_v54 = vld [vmem:[#allocation3 + $0x30] sm:$0xff]  ;;  %v1606_v59 = vld [vmem:[#allocation3 + $0x38] sm:$0xff]  ;;  %v1608_v57 = vpack.c.bf16 %v1602_v61, %v1601_v3 }
 0x64c   :  { %2170 = vmatprep.mubr.bf16.mxu0 %v1607_v38  ;;  %v1610_v62 = vpack.c.bf16 %v1606_v59, %v1605_v54 }
 0x64d   :  { %2174 = vmatprep.mubr.bf16.mxu1 %v1609_v41  ;;  %2171 = vmatmul.mubr.bf16.vlgmr.msra.gmra.mrb[0].mxu0 %v1608_v57 }
 0x64e   :  { %2175 = vmatmul.mubr.bf16.vlgmr.msra.gmra.mrb[0].mxu1 %v1610_v62 }
 0x720   :  { %v2172_v60 = vpop.f32.mrb[0].mxu0 }
 0x721   :  { %v2176_v55 = vpop.f32.mrb[0].mxu1  ;;  %v1725_v4 = vadd.f32 %v2172_v60, %v2102_v56  ;;  %v1716_v5 = vpop.f32.mrb[1].mxu0 }
 0x722   :  { %v1732_v58 = vpop.f32.mrb[1].mxu1  ;;  %v1717_v8 = vadd.f32 %v2102_v56, %v1716_v5  ;;  %v2173_v11 = vpop.f32.mrb[2].mxu0  ;;  %v1741_v50 = vadd.f32 %v2176_v55, %v2102_v56 }
 0x723   :  { %v2177_v48 = vpop.f32.mrb[2].mxu1  ;;  %1751 = vmax.xlane.f32.xlu1 %v1725_v4  ;;  %v1719_v14 = vpop.f32.mrb[3].mxu0  ;;  %v1728_v18 = vadd.f32 %v2173_v11, %v2102_v56  ;;  %v1733_v23 = vadd.f32 %v2102_v56, %v1732_v58 }
 0x724   :  { %v1735_v15 = vpop.f32.mrb[3].mxu1  ;;  %1747 = vmax.xlane.f32.xlu0 %v1717_v8  ;;  %v1720_v19 = vadd.f32 %v2102_v56, %v1719_v14  ;;  %v1744_v46 = vadd.f32 %v2177_v48, %v2102_v56 }
 0x725   :  { %v1736_v22 = vadd.f32 %v2102_v56, %v1735_v15 }
 0x727   :  { %1753 = vmax.xlane.f32.xlu1 %v1728_v18 }
 0x728   :  { %1749 = vmax.xlane.f32.xlu0 %v1720_v19 }
 0x72b   :  { %1757 = vmax.xlane.f32.xlu1 %v1736_v22 }
 0x72c   :  { %1755 = vmax.xlane.f32.xlu0 %v1733_v23 }
 0x72f   :  { %1761 = vmax.xlane.f32.xlu1 %v1744_v46 }
 0x730   :  { %1759 = vmax.xlane.f32.xlu0 %v1741_v50 }
 0x7b0   :  { %v1752_v53 = vpop.xlane.xlu1 %1751 }
 0x7b1   :  { %vm1765_vm3 = vcmp.eq.f32.partialorder %v1725_v4, %v1752_v53  ;;  %v1748_v0 = vpop.xlane.xlu0 %1747 }
 0x7b2   :  { %v1773_v47 = vsel %vm1765_vm3, %v3441_v44, 2147483647  ;;  %vm1763_vm4 = vcmp.eq.f32.partialorder %v1717_v8, %v1748_v0  ;;  %vm1923_vm3 = vcmask 1041409  }
 0x7b3   :  { %v1808_v49 = vshra.s32 %v1773_v47, 16  ;;  %v1771_v1 = vsel %vm1763_vm4, %v3441_v44, 2147483647  ;;  %v1807_v39 = vand.u32 65535, %v1773_v47  ;;  %vm1925_vm4 = vcmask 1042434  }
 0x7b4   :  { %v1754_v2 = vpop.xlane.xlu1 %1753  ;;  %v1780_v6 = vshra.s32 %v1771_v1, 16  ;;  %v1779_v41 = vand.u32 65535, %v1771_v1 }
 0x7b5   :  { %vm1766_vm5 = vcmp.eq.f32.partialorder %v1728_v18, %v1754_v2  ;;  %v1750_v7 = vpop.xlane.xlu0 %1749  ;;  %v1810_v9 = vcvt.s32.f32 %v1808_v49  ;;  %v1809_v40 = vcvt.s32.f32 %v1807_v39 }
 0x7b6   :  { %v1774_v10 = vsel %vm1766_vm5, %v3441_v44, 2147483647  ;;  %vm1764_vm6 = vcmp.eq.f32.partialorder %v1720_v19, %v1750_v7  ;;  %v1782_v24 = vcvt.s32.f32 %v1780_v6  ;;  %v1781_v52 = vcvt.s32.f32 %v1779_v41 }
 0x7b7   :  { %v1822_v12 = vshra.s32 %v1774_v10, 16  ;;  %v1772_v13 = vsel %vm1764_vm6, %v3441_v44, 2147483647  ;;  %1811 = vmin.xlane.f32.xlu0 %v1810_v9  ;;  %v1821_v42 = vand.u32 65535, %v1774_v10  ;;  %vm1927_vm5 = vcmask 1043459  }
 0x7b8   :  { %v1758_v16 = vpop.xlane.xlu1 %1757  ;;  %v1794_v17 = vshra.s32 %v1772_v13, 16  ;;  %v1793_v61 = vand.u32 65535, %v1772_v13  ;;  %vm1929_vm6 = vcmask 1044484  }
 0x7b9   :  { %vm1768_vm7 = vcmp.eq.f32.partialorder %v1736_v22, %v1758_v16  ;;  %v1756_v20 = vpop.xlane.xlu0 %1755  ;;  %v1824_v21 = vcvt.s32.f32 %v1822_v12  ;;  %v1823_v3 = vcvt.s32.f32 %v1821_v42 }
 0x7ba   :  { %v1776_v25 = vsel %vm1768_vm7, %v3441_v44, 2147483647  ;;  %vm1767_vm8 = vcmp.eq.f32.partialorder %v1733_v23, %v1756_v20  ;;  %v1796_v31 = vcvt.s32.f32 %v1794_v17  ;;  %v1795_v60 = vcvt.s32.f32 %v1793_v61 }
 0x7bb   :  { %v1775_v26 = vsel %vm1767_vm8, %v3441_v44, 2147483647  ;;  %1825 = vmin.xlane.f32.xlu1 %v1824_v21  ;;  %1783 = vmin.xlane.f32.xlu0 %v1782_v24  ;;  %v1850_v29 = vshra.s32 %v1776_v25, 16  ;;  %v1849_v55 = vand.u32 65535, %v1776_v25  ;;  %vm1931_vm7 = vcmask 1045509  }
 0x7bc   :  { %v1836_v27 = vshra.s32 %v1775_v26, 16  ;;  %v1762_v28 = vpop.xlane.xlu1 %1761  ;;  %v1835_v57 = vand.u32 65535, %v1775_v26  ;;  %vm1933_vm8 = vcmask 1046534  }
 0x7bd   :  { %vm1770_vm9 = vcmp.eq.f32.partialorder %v1744_v46, %v1762_v28  ;;  %v1760_v30 = vpop.xlane.xlu0 %1759  ;;  %v1852_v36 = vcvt.s32.f32 %v1850_v29  ;;  %v1851_v14 = vcvt.s32.f32 %v1849_v55 }
 0x7be   :  { %v1778_v33 = vsel %vm1770_vm9, %v3441_v44, 2147483647  ;;  %vm1769_vm10 = vcmp.eq.f32.partialorder %v1741_v50, %v1760_v30  ;;  %v1838_v34 = vcvt.s32.f32 %v1836_v27  ;;  %v1837_v5 = vcvt.s32.f32 %v1835_v57 }
 0x7bf   :  { %v1777_v43 = vsel %vm1769_vm10, %v3441_v44, 2147483647  ;;  %1797 = vmin.xlane.f32.xlu1 %v1796_v31  ;;  %v1878_v35 = vshra.s32 %v1778_v33, 16  ;;  %v1877_v15 = vand.u32 65535, %v1778_v33  ;;  %vm1935_vm9 = vcmask 1047559  }
 0x7c0   :  { %v1864_v51 = vshra.s32 %v1777_v43, 16  ;;  %1839 = vmin.xlane.f32.xlu0 %v1838_v34  ;;  %v1863_v58 = vand.u32 65535, %v1777_v43  ;;  %vm1937_vm10 = vcmask 64512  }
 0x7c1   :  { %v1880_v38 = vcvt.s32.f32 %v1878_v35  ;;  %v1879_v50 = vcvt.s32.f32 %v1877_v15 }
 0x7c2   :  { %v1866_v37 = vcvt.s32.f32 %v1864_v51  ;;  %v1865_v19 = vcvt.s32.f32 %v1863_v58 }
 0x7c3   :  { %1853 = vmin.xlane.f32.xlu1 %v1852_v36 }
 0x7c4   :  { %1867 = vmin.xlane.f32.xlu0 %v1866_v37 }
 0x7c7   :  { %1881 = vmin.xlane.f32.xlu1 %v1880_v38 }
 0x844   :  { %v1812_v45 = vpop.xlane.xlu0 %1811 }
 0x845   :  { %vm1813_vm11 = vcmp.eq.f32.partialorder %v1810_v9, %v1812_v45  ;;  %v1818_v1 = vcvt.f32.s32 %v1812_v45 }
 0x846   :  { %v1814_v32 = vsel %vm1813_vm11, %v1809_v40, inf }
 0x847   :  { %1815 = vmin.xlane.f32.xlu0 %v1814_v32  ;;  %v1819_v20 = vshll.u32 %v1818_v1, 16 }
 0x848   :  { %v1826_v54 = vpop.xlane.xlu1 %1825  ;;  %v1784_v59 = vpop.xlane.xlu0 %1783 }
 0x849   :  { %vm1827_vm12 = vcmp.eq.f32.partialorder %v1824_v21, %v1826_v54  ;;  %vm1785_vm13 = vcmp.eq.f32.partialorder %v1782_v24, %v1784_v59  ;;  %v1790_v49 = vcvt.f32.s32 %v1784_v59  ;;  %v1832_v7 = vcvt.f32.s32 %v1826_v54 }
 0x84a   :  { %v1828_v62 = vsel %vm1827_vm12, %v1823_v3, inf  ;;  %v1786_v56 = vsel %vm1785_vm13, %v1781_v52, inf  ;;  %v1893_v24 = vsub.s32 %v3441_v44, %v3035_v63 }
 0x84b   :  { %1829 = vmin.xlane.f32.xlu1 %v1828_v62  ;;  %1787 = vmin.xlane.f32.xlu0 %v1786_v56  ;;  %v1791_v16 = vshll.u32 %v1790_v49, 16  ;;  %v1833_v26 = vshll.u32 %v1832_v7, 16 }
 0x84c   :  { %v1798_v4 = vpop.xlane.xlu1 %1797 }
 0x84d   :  { %v1840_v8 = vpop.xlane.xlu0 %1839  ;;  %vm1799_vm14 = vcmp.eq.f32.partialorder %v1796_v31, %v1798_v4  ;;  %v1804_v9 = vcvt.f32.s32 %v1798_v4 }
 0x84e   :  { %v1800_v11 = vsel %vm1799_vm14, %v1795_v60, inf  ;;  %vm1841_vm15 = vcmp.eq.f32.partialorder %v1838_v34, %v1840_v8  ;;  %v1846_v12 = vcvt.f32.s32 %v1840_v8 }
 0x84f   :  { %1801 = vmin.xlane.f32.xlu1 %v1800_v11  ;;  %v1842_v48 = vsel %vm1841_vm15, %v1837_v5, inf  ;;  %v1805_v27 = vshll.u32 %v1804_v9, 16 }
 0x850   :  { %v1854_v18 = vpop.xlane.xlu1 %1853  ;;  %1843 = vmin.xlane.f32.xlu0 %v1842_v48  ;;  %v1847_v31 = vshll.u32 %v1846_v12, 16 }
 0x851   :  { %v1868_v22 = vpop.xlane.xlu0 %1867  ;;  %vm1855_vm0 = vcmp.eq.f32.partialorder %v1852_v36, %v1854_v18  ;;  %v1860_v21 = vcvt.f32.s32 %v1854_v18 }
 0x852   :  { %v1856_v23 = vsel %vm1855_vm0, %v1851_v14, inf  ;;  %vm1869_vm1 = vcmp.eq.f32.partialorder %v1866_v37, %v1868_v22  ;;  %v1874_v33 = vcvt.f32.s32 %v1868_v22 }
 0x853   :  { %1857 = vmin.xlane.f32.xlu1 %v1856_v23  ;;  %v1870_v46 = vsel %vm1869_vm1, %v1865_v19, inf  ;;  %v1861_v36 = vshll.u32 %v1860_v21, 16 }
 0x854   :  { %v1882_v53 = vpop.xlane.xlu1 %1881  ;;  %1871 = vmin.xlane.f32.xlu0 %v1870_v46  ;;  %v1875_v42 = vshll.u32 %v1874_v33, 16 }
 0x855   :  { %vm1883_vm2 = vcmp.eq.f32.partialorder %v1880_v38, %v1882_v53  ;;  %v1888_v37 = vcvt.f32.s32 %v1882_v53 }
 0x856   :  { %v1884_v0 = vsel %vm1883_vm2, %v1879_v50, inf }
 0x857   :  { %1885 = vmin.xlane.f32.xlu1 %v1884_v0  ;;  %v1889_v56 = vshll.u32 %v1888_v37, 16 }
 0x8d4   :  { %v1816_v47 = vpop.xlane.xlu0 %1815 }
 0x8d5   :  { %v1817_v13 = vcvt.f32.s32 %v1816_v47 }
 0x8d7   :  { %v1820_v34 = vadd.s32 %v1819_v20, %v1817_v13 }
 0x8d8   :  { %v1830_v2 = vpop.xlane.xlu1 %1829  ;;  %v1788_v6 = vpop.xlane.xlu0 %1787 }
 0x8d9   :  { %v1789_v10 = vcvt.f32.s32 %v1788_v6  ;;  %v1831_v17 = vcvt.f32.s32 %v1830_v2  ;;  %v1902_v45 = vrot.slane %v1820_v34, %v1893_v24 }
 0x8db   :  { %v1792_v28 = vadd.s32 %v1791_v16, %v1789_v10  ;;  %v1834_v51 = vadd.s32 %v1833_v26, %v1831_v17 }
 0x8dc   :  { %v1802_v25 = vpop.xlane.xlu1 %1801 }
 0x8dd   :  { %v1803_v29 = vcvt.f32.s32 %v1802_v25  ;;  %v1844_v30 = vpop.xlane.xlu0 %1843  ;;  %v1894_v40 = vrot.slane %v1792_v28, %v1893_v24  ;;  %v1906_v52 = vrot.slane %v1834_v51, %v1893_v24 }
 0x8de   :  { %v1845_v43 = vcvt.f32.s32 %v1844_v30 }
 0x8df   :  { %v1806_v35 = vadd.s32 %v1805_v27, %v1803_v29 }
 0x8e0   :  { %v1848_v38 = vadd.s32 %v1847_v31, %v1845_v43  ;;  %v1858_v39 = vpop.xlane.xlu1 %1857 }
 0x8e1   :  { %v1898_v63 = vrot.slane %v1806_v35, %v1893_v24  ;;  %v1859_v44 = vcvt.f32.s32 %v1858_v39  ;;  %v1872_v41 = vpop.xlane.xlu0 %1871 }
 0x8e2   :  { %v1873_v32 = vcvt.f32.s32 %v1872_v41  ;;  %v1910_v59 = vrot.slane %v1848_v38, %v1893_v24 }
 0x8e3   :  { %v1924_v3 = vsel %vm1923_vm3, %v1898_v63, %v1894_v40  ;;  %v1862_v61 = vadd.s32 %v1861_v36, %v1859_v44 }
 0x8e4   :  { %v1926_v54 = vsel %vm1925_vm4, %v1902_v45, %v1924_v3  ;;  %v1876_v57 = vadd.s32 %v1875_v42, %v1873_v32  ;;  %v1886_v62 = vpop.xlane.xlu1 %1885 }
 0x8e5   :  { %v1928_v60 = vsel %vm1927_vm5, %v1906_v52, %v1926_v54  ;;  %v1914_v55 = vrot.slane %v1862_v61, %v1893_v24  ;;  %v1887_v4 = vcvt.f32.s32 %v1886_v62 }
 0x8e6   :  { %v1930_v5 = vsel %vm1929_vm6, %v1910_v59, %v1928_v60  ;;  %v1918_v58 = vrot.slane %v1876_v57, %v1893_v24 }
 0x8e7   :  { %v1932_v8 = vsel %vm1931_vm7, %v1914_v55, %v1930_v5  ;;  %v1890_v11 = vadd.s32 %v1889_v56, %v1887_v4 }
 0x8e8   :  { %v1934_v14 = vsel %vm1933_vm8, %v1918_v58, %v1932_v8 }
 0x8e9   :  { %v1922_v48 = vrot.slane %v1890_v11, %v1893_v24 }
 0x8eb   :  { %v1936_v15 = vsel %vm1935_vm9, %v1922_v48, %v1934_v14 }
 0x8ec   :  { %1938 = vst.msk [vmem:[%s3349_s14] sm:$0xff] %vm1937_vm10, %v1936_v15 }
 0x8ed   :  { %1947 = vsyncpa [#allocation8], 1 }
 0x8ee   :  { %1948 = vsyncpa [#allocation10], 1 }
 0x8ef   :  { %1949 = vsyncpa [#allocation13], 1 }
 0x8f0   :  { %1950 = vsyncpa [#allocation16], 1 }
 0x8f1   :  { %1951 = vsyncpa [#allocation19], 1 }

</bundles_post_ra>
